<compile_context>
chip_gen: v7x
topology: tpu7x:2x2x1
jax: 0.10.0
libtpu: 0.0.40
codegen_flags: <defaults>
</compile_context>

<pallas_src>
import functools

import jax
import jax.numpy as jnp
from jax.experimental import pallas as pl
from jax.experimental.pallas import tpu as pltpu


# ----------------------------------------------------------------------------
# Helpers for BlockSpecs
# ----------------------------------------------------------------------------
def _spec_full(shape):
    nd = len(shape)
    return pl.BlockSpec(shape, lambda i, _nd=nd: (0,) * _nd)


# ----------------------------------------------------------------------------
# Pallas kernels
# ----------------------------------------------------------------------------
def _conv_bn_kernel(p_ref, w_ref, b_ref, o_ref, *, relu_in):
    """out = (relu?(patches) @ w_folded) + bias    (BN scale pre-folded into w)."""
    x = p_ref[...]
    if relu_in:
        x = jnp.maximum(x, 0.0)
    acc = jnp.dot(x, w_ref[...], preferred_element_type=jnp.float32)
    o_ref[...] = (acc + b_ref[...]).astype(o_ref.dtype)


def conv_bn_matmul(patches, w, bias, relu_in=False, block_m=256):
    """patches: (M, K) bf16, w: (K, C) bf16 (scale folded), bias: (1, C) f32."""
    M, K = patches.shape
    C = w.shape[1]
    bm = block_m if (M % block_m == 0) else M
    kernel = functools.partial(_conv_bn_kernel, relu_in=relu_in)
    return pl.pallas_call(
        kernel,
        out_shape=jax.ShapeDtypeStruct((M, C), jnp.float32),
        grid=(M // bm,),
        in_specs=[
            pl.BlockSpec((bm, K), lambda i: (i, 0)),
            pl.BlockSpec((K, C), lambda i: (0, 0)),
            pl.BlockSpec((1, C), lambda i: (0, 0)),
        ],
        out_specs=pl.BlockSpec((bm, C), lambda i: (i, 0)),
        compiler_params=pltpu.CompilerParams(dimension_semantics=("parallel",)),
    )(patches, w, bias)


def _make_block_kernel(down_kind):
    """Fused ResNetBasicblock kernel: conv_a + conv_b + downsample + residual."""

    def kernel(*refs):
        if down_kind == "identity":
            pa_ref, wa_ref, ba_ref, wb_ref, bb_ref, s_ref, res_ref, o_ref = refs
        elif down_kind == "avg_conv":
            pa_ref, wa_ref, ba_ref, wb_ref, bb_ref, s_ref, wd_ref, o_ref = refs
        else:  # "rcb"
            pa_ref, wa_ref, ba_ref, wb_ref, bb_ref, s_ref, wd_ref, bd_ref, o_ref = refs

        x_raw = pa_ref[...]                       # (M, 9*Cin) bf16 im2col patches
        x_relu = jnp.maximum(x_raw, 0.0)          # ReLU used by the ReLUConvBN paths

        # conv_a: ReLU -> 3x3 conv -> BN (scale folded into wa)
        y = jnp.dot(x_relu, wa_ref[...], preferred_element_type=jnp.float32)
        y = y + ba_ref[...]
        yb = jnp.maximum(y, 0.0).astype(jnp.bfloat16)   # ReLU entering conv_b

        # residual / downsample branch (reuses the already-loaded patches)
        if down_kind == "identity":
            res = res_ref[...]                                            # exact f32 x
        elif down_kind == "avg_conv":
            # AvgPool2d(2,2) + 1x1 conv == matmul with w/4 placed on the 4 relevant
            # taps of the stride-2 conv_a patch layout (no ReLU, no BN).
            res = jnp.dot(x_raw, wd_ref[...], preferred_element_type=jnp.float32)
        else:  # rcb: ReLU -> 1x1 conv -> BN, center tap of the conv_a patches
            res = jnp.dot(x_relu, wd_ref[...], preferred_element_type=jnp.float32)
            res = res + bd_ref[...]

        # conv_b: 3x3 / stride 1 / pad 1 entirely in VMEM; per-tap gather is a
        # precomputed 0/1 shift matrix so everything stays on the MXU.
        acc = res + bb_ref[...]
        for t in range(9):
            tap = jnp.dot(s_ref[t], yb, preferred_element_type=jnp.float32)
            acc = acc + jnp.dot(tap.astype(jnp.bfloat16), wb_ref[t],
                                preferred_element_type=jnp.float32)
        o_ref[...] = acc.astype(o_ref.dtype)

    return kernel


def _pool_head_kernel(x_ref, p_ref, w_ref, b_ref, o_ref):
    """logits = (pool_matrix @ x) @ w + b   (global avgpool fused with the head)."""
    feat = jnp.dot(p_ref[...], x_ref[...], preferred_element_type=jnp.float32)
    logits = jnp.dot(feat.astype(jnp.bfloat16), w_ref[...],
                     preferred_element_type=jnp.float32) + b_ref[...]
    o_ref[...] = logits.astype(o_ref.dtype)


# ----------------------------------------------------------------------------
# Plain-JAX glue (layout / patch extraction) -- fused by XLA under jit
# ----------------------------------------------------------------------------
def im2col(x, k, stride, pad):
    """x: (N,H,W,C) NHWC -> patches (N*Ho*Wo, k*k*C), tap order (kh, kw, c)."""
    N, H, W, C = x.shape
    xp = jnp.pad(x, ((0, 0), (pad, pad), (pad, pad), (0, 0)))
    Ho = (H + 2 * pad - k) // stride + 1
    Wo = (W + 2 * pad - k) // stride + 1
    cols = []
    for kh in range(k):
        for kw in range(k):
            cols.append(xp[:, kh:kh + stride * Ho:stride,
                           kw:kw + stride * Wo:stride, :])
    patches = jnp.concatenate(cols, axis=-1)
    return patches.reshape(N * Ho * Wo, k * k * C), (N, Ho, Wo)


def shift_matrices(N, H, W):
    """(9, M, M) 0/1 matrices: S_t @ y gathers the 3x3 tap t (pad=1, stride=1)."""
    M = N * H * W
    m = jnp.arange(M)
    n = m // (H * W)
    i = (m // W) % H
    j = m % W
    mats = []
    for kh in range(3):
        for kw in range(3):
            dh, dw = kh - 1, kw - 1
            ii, jj = i + dh, j + dw
            valid = (ii >= 0) & (ii < H) & (jj >= 0) & (jj < W)
            src = n * H * W + jnp.clip(ii, 0, H - 1) * W + jnp.clip(jj, 0, W - 1)
            sel = (jnp.arange(M)[None, :] == src[:, None]) & valid[:, None]
            mats.append(sel)
    return jnp.stack(mats).astype(jnp.bfloat16)


# ----------------------------------------------------------------------------
# Parameter construction (deterministic, weights pre-folded for the kernels)
# ----------------------------------------------------------------------------
def kaiming_conv(key, cout, cin, k):
    fan_out = cout * k * k
    std = (2.0 / fan_out) ** 0.5
    return jax.random.normal(key, (cout, cin, k, k), jnp.float32) * std


def bn_fold(c, eps=1e-5):
    # gamma=1, beta=0, running_mean=0, running_var=1  (PyTorch init, eval mode)
    scale = jnp.full((c,), 1.0 / jnp.sqrt(1.0 + eps), jnp.float32)
    bias = jnp.zeros((1, c), jnp.float32)
    return scale, bias


def fold_conv3x3(w_oihw, scale):
    cout, cin, k, _ = w_oihw.shape
    w2 = jnp.transpose(w_oihw, (2, 3, 1, 0)).reshape(k * k * cin, cout)
    return (w2 * scale[None, :]).astype(jnp.bfloat16)


def fold_conv3x3_taps(w_oihw, scale):
    cout, cin, k, _ = w_oihw.shape
    w2 = jnp.transpose(w_oihw, (2, 3, 1, 0)).reshape(k * k, cin, cout)
    return (w2 * scale[None, None, :]).astype(jnp.bfloat16)


def init_params(key, base_channel=8, macro="41", num_classes=10):
    keys = iter(jax.random.split(key, 64))
    params = {}

    c_half = base_channel // 2
    s1, b1 = bn_fold(c_half)
    s2, b2 = bn_fold(base_channel)
    params["stem"] = {
        "w1": fold_conv3x3(kaiming_conv(next(keys), c_half, 3, 3), s1), "b1": b1,
        "w2": fold_conv3x3(kaiming_conv(next(keys), base_channel, c_half, 3), s2),
        "b2": b2,
    }

    inplanes = base_channel
    layers = []
    for lt_char in macro:
        lt = int(lt_char)
        target = inplanes * 2 if lt % 2 == 0 else inplanes
        stride = 2 if lt > 2 else 1
        blocks = []
        cin = inplanes
        for bidx in range(2):  # num_blocks = 2
            s_blk = stride if bidx == 0 else 1
            cout = target
            blk = {"stride": s_blk}
            sa, ba = bn_fold(cout)
            blk["wa"] = fold_conv3x3(kaiming_conv(next(keys), cout, cin, 3), sa)
            blk["ba"] = ba
            sb, bb = bn_fold(cout)
            blk["wb"] = fold_conv3x3_taps(kaiming_conv(next(keys), cout, cout, 3), sb)
            blk["bb"] = bb
            if s_blk == 2:
                # AvgPool2d(2,2) + Conv2d(cin, cout, 1, bias=False): weight/4 placed
                # on taps {(1,1),(1,2),(2,1),(2,2)} of the stride-2 conv_a patches.
                w1x1 = kaiming_conv(next(keys), cout, cin, 1)
                w1f = jnp.transpose(w1x1[:, :, 0, 0], (1, 0)) * 0.25
                wd = jnp.zeros((9 * cin, cout), jnp.float32)
                for t in (4, 5, 7, 8):
                    wd = wd.at[t * cin:(t + 1) * cin, :].set(w1f)
                blk["down_kind"] = "avg_conv"
                blk["wd"] = wd.astype(jnp.bfloat16)
            elif cin != cout:
                # ReLUConvBN 1x1 downsample: BN-folded weight on the center tap.
                w1x1 = kaiming_conv(next(keys), cout, cin, 1)
                sd, bd = bn_fold(cout)
                w1f = jnp.transpose(w1x1[:, :, 0, 0], (1, 0)) * sd[None, :]
                wd = jnp.zeros((9 * cin, cout), jnp.float32)
                wd = wd.at[4 * cin:5 * cin, :].set(w1f)
                blk["down_kind"] = "rcb"
                blk["wd"] = wd.astype(jnp.bfloat16)
                blk["bd"] = bd
            else:
                blk["down_kind"] = "identity"
            blocks.append(blk)
            cin = cout
        inplanes = target
        layers.append(blocks)
    params["layers"] = layers

    fan_in = inplanes
    bound = float(1.0 / (fan_in ** 0.5))
    params["head"] = {
        "w": jax.random.uniform(next(keys), (fan_in, num_classes), jnp.float32,
                                -bound, bound).astype(jnp.bfloat16),
        "b": jax.random.uniform(next(keys), (1, num_classes), jnp.float32,
                                -bound, bound),
    }
    return params


# ----------------------------------------------------------------------------
# Forward pass (matches MacroNet.forward with structure='full', eval mode)
# ----------------------------------------------------------------------------
def basic_block(x, blk):
    """x: (N,H,W,Cin) f32 -> (N,Ho,Wo,Cout) f32, one fused pallas_call."""
    N, H, W, Cin = x.shape
    stride = blk["stride"]
    Cout = blk["wa"].shape[1]
    patches, (_, Ho, Wo) = im2col(x, 3, stride, 1)
    M = N * Ho * Wo
    pa = patches.astype(jnp.bfloat16)
    smats = shift_matrices(N, Ho, Wo)                    # (9, M, M) bf16 (const-folded)

    kind = blk["down_kind"]
    args = [pa, blk["wa"], blk["ba"], blk["wb"], blk["bb"], smats]
    if kind == "identity":
        args.append(x.reshape(M, Cout))                  # exact f32 residual
    elif kind == "avg_conv":
        args.append(blk["wd"])
    else:  # rcb
        args += [blk["wd"], blk["bd"]]

    out = pl.pallas_call(
        _make_block_kernel(kind),
        out_shape=jax.ShapeDtypeStruct((M, Cout), jnp.float32),
        grid=(1,),
        in_specs=[_spec_full(a.shape) for a in args],
        out_specs=_spec_full((M, Cout)),
    )(*args)
    return out.reshape(N, Ho, Wo, Cout)


def pool_and_head(x, w, b):
    """Fused global average pool + Linear head."""
    N, H, W, C = x.shape
    HW = H * W
    x2 = x.reshape(N * HW, C).astype(jnp.bfloat16)
    pool = (jnp.repeat(jnp.eye(N, dtype=jnp.float32), HW, axis=1) / HW
            ).astype(jnp.bfloat16)                       # (N, N*HW)
    nc = w.shape[1]
    args = [x2, pool, w, b]
    return pl.pallas_call(
        _pool_head_kernel,
        out_shape=jax.ShapeDtypeStruct((N, nc), jnp.float32),
        grid=(1,),
        in_specs=[_spec_full(a.shape) for a in args],
        out_specs=_spec_full((N, nc)),
    )(*args)


def macronet_forward(x_nchw, params):
    x = jnp.transpose(x_nchw, (0, 2, 3, 1))              # NCHW -> NHWC
    stem = params["stem"]
    # stem: Conv3x3 s2 + BN
    p, (N, Ho, Wo) = im2col(x, 3, 2, 1)
    x = conv_bn_matmul(p.astype(jnp.bfloat16), stem["w1"], stem["b1"],
                       relu_in=False).reshape(N, Ho, Wo, -1)
    # stem: ReLUConvBN(3x3, s2)
    p, (N, Ho, Wo) = im2col(x, 3, 2, 1)
    x = conv_bn_matmul(p.astype(jnp.bfloat16), stem["w2"], stem["b2"],
                       relu_in=True).reshape(N, Ho, Wo, -1)
    for layer in params["layers"]:
        for blk in layer:
            x = basic_block(x, blk)
    # global avgpool + view + head, fused
    return pool_and_head(x, params["head"]["w"], params["head"]["b"])


# ----------------------------------------------------------------------------
if __name__ == "__main__":
    key = jax.random.PRNGKey(0)
    kx, kp = jax.random.split(key)
    x = jax.random.normal(kx, (2, 3, 32, 32), jnp.float32)   # NCHW, like PyTorch
    params = init_params(kp, base_channel=8, macro="41", num_classes=10)

    fwd = jax.jit(lambda inp: macronet_forward(inp, params))
    out = jax.block_until_ready(fwd(x))
    assert out.shape == (2, 10), out.shape
    assert bool(jnp.all(jnp.isfinite(out)))
    print("KERNEL_OK")
</pallas_src>

<mosaic_0001>
module attributes {stable_mosaic.version = 11 : i64} {
  func.func @_conv_bn_kernel(%arg0: i32, %arg1: memref<256x27xbf16, #tpu.memory_space<vmem>>, %arg2: memref<27x4xbf16, #tpu.memory_space<vmem>>, %arg3: memref<1x4xf32, #tpu.memory_space<vmem>>, %arg4: memref<256x4xf32, #tpu.memory_space<vmem>>) attributes {dimension_semantics = [#tpu.dimension_semantics<parallel>], iteration_bounds = array<i64: 2>, scalar_prefetch = 0 : i64, scratch_operands = 0 : i64, tpu.core_type = #tpu.core_type<tc>, window_params = [{transform_indices = @transform_0, window_bounds = array<i64: 256, 27>}, {pipeline_mode = #tpu.pipeline_mode<synchronous>, transform_indices = @transform_1, window_bounds = array<i64: 27, 4>}, {pipeline_mode = #tpu.pipeline_mode<synchronous>, transform_indices = @transform_2, window_bounds = array<i64: 1, 4>}, {transform_indices = @transform_3, window_bounds = array<i64: 256, 4>}]} {
    %c0 = arith.constant 0 : index
    %c0_0 = arith.constant 0 : index
    %0 = vector.load %arg1[%c0, %c0_0] : memref<256x27xbf16, #tpu.memory_space<vmem>>, vector<256x27xbf16>
    %c0_1 = arith.constant 0 : index
    %c0_2 = arith.constant 0 : index
    %1 = vector.load %arg2[%c0_1, %c0_2] : memref<27x4xbf16, #tpu.memory_space<vmem>>, vector<27x4xbf16>
    %cst = arith.constant dense<0.000000e+00> : vector<256x4xf32>
    %2 = tpu.matmul %0, %1, %cst {dimension_numbers = #tpu.dot_dimension_numbers<[1], [0], [0], [1], [0, 0, 1, 1], [], []>} : vector<256x27xbf16>, vector<27x4xbf16>, vector<256x4xf32> -> vector<256x4xf32>
    %c0_3 = arith.constant 0 : index
    %c0_4 = arith.constant 0 : index
    %3 = vector.load %arg3[%c0_3, %c0_4] : memref<1x4xf32, #tpu.memory_space<vmem>>, vector<1x4xf32>
    %4 = vector.broadcast %3 : vector<1x4xf32> to vector<256x4xf32>
    %5 = arith.addf %2, %4 : vector<256x4xf32>
    %c0_5 = arith.constant 0 : index
    %c0_6 = arith.constant 0 : index
    %6 = vector.load %arg4[%c0_5, %c0_6] : memref<256x4xf32, #tpu.memory_space<vmem>>, vector<256x4xf32>
    tpu.vector_store %arg4[%c0_5, %c0_6], %5 {strides = array<i32>} : memref<256x4xf32, #tpu.memory_space<vmem>>, vector<256x4xf32>,
    return
  }
  func.func @transform_0(%arg0: i32) -> (i32, i32) {
    %c0_i32 = arith.constant 0 : i32
    %c0_i32_0 = arith.constant 0 : i32
    return %arg0, %c0_i32 : i32, i32
  }
  func.func @transform_1(%arg0: i32) -> (i32, i32) {
    %c0_i32 = arith.constant 0 : i32
    %c0_i32_0 = arith.constant 0 : i32
    %c0_i32_1 = arith.constant 0 : i32
    return %c0_i32, %c0_i32_0 : i32, i32
  }
  func.func @transform_2(%arg0: i32) -> (i32, i32) {
    %c0_i32 = arith.constant 0 : i32
    %c0_i32_0 = arith.constant 0 : i32
    %c0_i32_1 = arith.constant 0 : i32
    return %c0_i32, %c0_i32_0 : i32, i32
  }
  func.func @transform_3(%arg0: i32) -> (i32, i32) {
    %c0_i32 = arith.constant 0 : i32
    %c0_i32_0 = arith.constant 0 : i32
    return %arg0, %c0_i32 : i32, i32
  }
}

module attributes {stable_mosaic.version = 11 : i64} {
  func.func @_conv_bn_kernel(%arg0: i32, %arg1: memref<128x36xbf16, #tpu.memory_space<vmem>>, %arg2: memref<36x8xbf16, #tpu.memory_space<vmem>>, %arg3: memref<1x8xf32, #tpu.memory_space<vmem>>, %arg4: memref<128x8xf32, #tpu.memory_space<vmem>>) attributes {dimension_semantics = [#tpu.dimension_semantics<parallel>], iteration_bounds = array<i64: 1>, scalar_prefetch = 0 : i64, scratch_operands = 0 : i64, tpu.core_type = #tpu.core_type<tc>, window_params = [{transform_indices = @transform_0, window_bounds = array<i64: 128, 36>}, {pipeline_mode = #tpu.pipeline_mode<synchronous>, transform_indices = @transform_1, window_bounds = array<i64: 36, 8>}, {pipeline_mode = #tpu.pipeline_mode<synchronous>, transform_indices = @transform_2, window_bounds = array<i64: 1, 8>}, {transform_indices = @transform_3, window_bounds = array<i64: 128, 8>}]} {
    %c0 = arith.constant 0 : index
    %c0_0 = arith.constant 0 : index
    %0 = vector.load %arg1[%c0, %c0_0] : memref<128x36xbf16, #tpu.memory_space<vmem>>, vector<128x36xbf16>
    %cst = arith.constant 0.000000e+00 : bf16
    %1 = vector.broadcast %cst : bf16 to vector<128x36xbf16>
    %2 = arith.maximumf %0, %1 : vector<128x36xbf16>
    %c0_1 = arith.constant 0 : index
    %c0_2 = arith.constant 0 : index
    %3 = vector.load %arg2[%c0_1, %c0_2] : memref<36x8xbf16, #tpu.memory_space<vmem>>, vector<36x8xbf16>
    %cst_3 = arith.constant dense<0.000000e+00> : vector<128x8xf32>
    %4 = tpu.matmul %2, %3, %cst_3 {dimension_numbers = #tpu.dot_dimension_numbers<[1], [0], [0], [1], [0, 0, 1, 1], [], []>} : vector<128x36xbf16>, vector<36x8xbf16>, vector<128x8xf32> -> vector<128x8xf32>
    %c0_4 = arith.constant 0 : index
    %c0_5 = arith.constant 0 : index
    %5 = vector.load %arg3[%c0_4, %c0_5] : memref<1x8xf32, #tpu.memory_space<vmem>>, vector<1x8xf32>
    %6 = vector.broadcast %5 : vector<1x8xf32> to vector<128x8xf32>
    %7 = arith.addf %4, %6 : vector<128x8xf32>
    %c0_6 = arith.constant 0 : index
    %c0_7 = arith.constant 0 : index
    %8 = vector.load %arg4[%c0_6, %c0_7] : memref<128x8xf32, #tpu.memory_space<vmem>>, vector<128x8xf32>
    tpu.vector_store %arg4[%c0_6, %c0_7], %7 {strides = array<i32>} : memref<128x8xf32, #tpu.memory_space<vmem>>, vector<128x8xf32>,
    return
  }
  func.func @transform_0(%arg0: i32) -> (i32, i32) {
    %c0_i32 = arith.constant 0 : i32
    %c0_i32_0 = arith.constant 0 : i32
    return %arg0, %c0_i32 : i32, i32
  }
  func.func @transform_1(%arg0: i32) -> (i32, i32) {
    %c0_i32 = arith.constant 0 : i32
    %c0_i32_0 = arith.constant 0 : i32
    %c0_i32_1 = arith.constant 0 : i32
    return %c0_i32, %c0_i32_0 : i32, i32
  }
  func.func @transform_2(%arg0: i32) -> (i32, i32) {
    %c0_i32 = arith.constant 0 : i32
    %c0_i32_0 = arith.constant 0 : i32
    %c0_i32_1 = arith.constant 0 : i32
    return %c0_i32, %c0_i32_0 : i32, i32
  }
  func.func @transform_3(%arg0: i32) -> (i32, i32) {
    %c0_i32 = arith.constant 0 : i32
    %c0_i32_0 = arith.constant 0 : i32
    return %arg0, %c0_i32 : i32, i32
  }
}

module attributes {stable_mosaic.version = 11 : i64} {
  func.func @kernel(%arg0: i32, %arg1: memref<32x144xbf16, #tpu.memory_space<vmem>>, %arg2: memref<144x16xbf16, #tpu.memory_space<vmem>>, %arg3: memref<1x16xf32, #tpu.memory_space<vmem>>, %arg4: memref<9x16x16xbf16, #tpu.memory_space<vmem>>, %arg5: memref<1x16xf32, #tpu.memory_space<vmem>>, %arg6: memref<9x32x32xbf16, #tpu.memory_space<vmem>>, %arg7: memref<32x16xf32, #tpu.memory_space<vmem>>, %arg8: memref<32x16xf32, #tpu.memory_space<vmem>>) attributes {dimension_semantics = [#tpu.dimension_semantics<arbitrary>], iteration_bounds = array<i64: 1>, scalar_prefetch = 0 : i64, scratch_operands = 0 : i64, tpu.core_type = #tpu.core_type<tc>, window_params = [{pipeline_mode = #tpu.pipeline_mode<synchronous>, transform_indices = @transform_0, window_bounds = array<i64: 32, 144>}, {pipeline_mode = #tpu.pipeline_mode<synchronous>, transform_indices = @transform_1, window_bounds = array<i64: 144, 16>}, {pipeline_mode = #tpu.pipeline_mode<synchronous>, transform_indices = @transform_2, window_bounds = array<i64: 1, 16>}, {pipeline_mode = #tpu.pipeline_mode<synchronous>, transform_indices = @transform_3, window_bounds = array<i64: 9, 16, 16>}, {pipeline_mode = #tpu.pipeline_mode<synchronous>, transform_indices = @transform_4, window_bounds = array<i64: 1, 16>}, {pipeline_mode = #tpu.pipeline_mode<synchronous>, transform_indices = @transform_5, window_bounds = array<i64: 9, 32, 32>}, {pipeline_mode = #tpu.pipeline_mode<synchronous>, transform_indices = @transform_6, window_bounds = array<i64: 32, 16>}, {pipeline_mode = #tpu.pipeline_mode<synchronous>, transform_indices = @transform_7, window_bounds = array<i64: 32, 16>}]} {
    %c0 = arith.constant 0 : index
    %c0_0 = arith.constant 0 : index
    %0 = vector.load %arg1[%c0, %c0_0] : memref<32x144xbf16, #tpu.memory_space<vmem>>, vector<32x144xbf16>
    %cst = arith.constant 0.000000e+00 : bf16
    %1 = vector.broadcast %cst : bf16 to vector<32x144xbf16>
    %2 = arith.maximumf %0, %1 : vector<32x144xbf16>
    %c0_1 = arith.constant 0 : index
    %c0_2 = arith.constant 0 : index
    %3 = vector.load %arg2[%c0_1, %c0_2] : memref<144x16xbf16, #tpu.memory_space<vmem>>, vector<144x16xbf16>
    %cst_3 = arith.constant dense<0.000000e+00> : vector<32x16xf32>
    %4 = tpu.matmul %2, %3, %cst_3 {dimension_numbers = #tpu.dot_dimension_numbers<[1], [0], [0], [1], [0, 0, 1, 1], [], []>} : vector<32x144xbf16>, vector<144x16xbf16>, vector<32x16xf32> -> vector<32x16xf32>
    %c0_4 = arith.constant 0 : index
    %c0_5 = arith.constant 0 : index
    %5 = vector.load %arg3[%c0_4, %c0_5] : memref<1x16xf32, #tpu.memory_space<vmem>>, vector<1x16xf32>
    %6 = vector.broadcast %5 : vector<1x16xf32> to vector<32x16xf32>
    %7 = arith.addf %4, %6 : vector<32x16xf32>
    %cst_6 = arith.constant 0.000000e+00 : f32
    %8 = vector.broadcast %cst_6 : f32 to vector<32x16xf32>
    %9 = arith.maximumf %7, %8 : vector<32x16xf32>
    %10 = arith.truncf %9 : vector<32x16xf32> to vector<32x16xbf16>
    %c0_7 = arith.constant 0 : index
    %c0_8 = arith.constant 0 : index
    %11 = vector.load %arg7[%c0_7, %c0_8] : memref<32x16xf32, #tpu.memory_space<vmem>>, vector<32x16xf32>
    %c0_9 = arith.constant 0 : index
    %c0_10 = arith.constant 0 : index
    %12 = vector.load %arg5[%c0_9, %c0_10] : memref<1x16xf32, #tpu.memory_space<vmem>>, vector<1x16xf32>
    %13 = vector.broadcast %12 : vector<1x16xf32> to vector<32x16xf32>
    %14 = arith.addf %11, %13 : vector<32x16xf32>
    %c0_11 = arith.constant 0 : index
    %c0_12 = arith.constant 0 : index
    %c0_13 = arith.constant 0 : index
    %15 = vector.load %arg6[%c0_11, %c0_12, %c0_13] : memref<9x32x32xbf16, #tpu.memory_space<vmem>>, vector<1x32x32xbf16>
    %16 = vector.shape_cast %15 : vector<1x32x32xbf16> to vector<32x32xbf16>
    %cst_14 = arith.constant dense<0.000000e+00> : vector<32x16xf32>
    %17 = tpu.matmul %16, %10, %cst_14 {dimension_numbers = #tpu.dot_dimension_numbers<[1], [0], [0], [1], [0, 0, 1, 1], [], []>} : vector<32x32xbf16>, vector<32x16xbf16>, vector<32x16xf32> -> vector<32x16xf32>
    %18 = arith.truncf %17 : vector<32x16xf32> to vector<32x16xbf16>
    %c0_15 = arith.constant 0 : index
    %c0_16 = arith.constant 0 : index
    %c0_17 = arith.constant 0 : index
    %19 = vector.load %arg4[%c0_15, %c0_16, %c0_17] : memref<9x16x16xbf16, #tpu.memory_space<vmem>>, vector<1x16x16xbf16>
    %20 = vector.shape_cast %19 : vector<1x16x16xbf16> to vector<16x16xbf16>
    %cst_18 = arith.constant dense<0.000000e+00> : vector<32x16xf32>
    %21 = tpu.matmul %18, %20, %cst_18 {dimension_numbers = #tpu.dot_dimension_numbers<[1], [0], [0], [1], [0, 0, 1, 1], [], []>} : vector<32x16xbf16>, vector<16x16xbf16>, vector<32x16xf32> -> vector<32x16xf32>
    %22 = arith.addf %14, %21 : vector<32x16xf32>
    %c1 = arith.constant 1 : index
    %c0_19 = arith.constant 0 : index
    %c0_20 = arith.constant 0 : index
    %23 = vector.load %arg6[%c1, %c0_19, %c0_20] : memref<9x32x32xbf16, #tpu.memory_space<vmem>>, vector<1x32x32xbf16>
    %24 = vector.shape_cast %23 : vector<1x32x32xbf16> to vector<32x32xbf16>
    %cst_21 = arith.constant dense<0.000000e+00> : vector<32x16xf32>
    %25 = tpu.matmul %24, %10, %cst_21 {dimension_numbers = #tpu.dot_dimension_numbers<[1], [0], [0], [1], [0, 0, 1, 1], [], []>} : vector<32x32xbf16>, vector<32x16xbf16>, vector<32x16xf32> -> vector<32x16xf32>
    %26 = arith.truncf %25 : vector<32x16xf32> to vector<32x16xbf16>
    %c1_22 = arith.constant 1 : index
    %c0_23 = arith.constant 0 : index
    %c0_24 = arith.constant 0 : index
    %27 = vector.load %arg4[%c1_22, %c0_23, %c0_24] : memref<9x16x16xbf16, #tpu.memory_space<vmem>>, vector<1x16x16xbf16>
    %28 = vector.shape_cast %27 : vector<1x16x16xbf16> to vector<16x16xbf16>
    %cst_25 = arith.constant dense<0.000000e+00> : vector<32x16xf32>
    %29 = tpu.matmul %26, %28, %cst_25 {dimension_numbers = #tpu.dot_dimension_numbers<[1], [0], [0], [1], [0, 0, 1, 1], [], []>} : vector<32x16xbf16>, vector<16x16xbf16>, vector<32x16xf32> -> vector<32x16xf32>
    %30 = arith.addf %22, %29 : vector<32x16xf32>
    %c2 = arith.constant 2 : index
    %c0_26 = arith.constant 0 : index
    %c0_27 = arith.constant 0 : index
    %31 = vector.load %arg6[%c2, %c0_26, %c0_27] : memref<9x32x32xbf16, #tpu.memory_space<vmem>>, vector<1x32x32xbf16>
    %32 = vector.shape_cast %31 : vector<1x32x32xbf16> to vector<32x32xbf16>
    %cst_28 = arith.constant dense<0.000000e+00> : vector<32x16xf32>
    %33 = tpu.matmul %32, %10, %cst_28 {dimension_numbers = #tpu.dot_dimension_numbers<[1], [0], [0], [1], [0, 0, 1, 1], [], []>} : vector<32x32xbf16>, vector<32x16xbf16>, vector<32x16xf32> -> vector<32x16xf32>
    %34 = arith.truncf %33 : vector<32x16xf32> to vector<32x16xbf16>
    %c2_29 = arith.constant 2 : index
    %c0_30 = arith.constant 0 : index
    %c0_31 = arith.constant 0 : index
    %35 = vector.load %arg4[%c2_29, %c0_30, %c0_31] : memref<9x16x16xbf16, #tpu.memory_space<vmem>>, vector<1x16x16xbf16>
    %36 = vector.shape_cast %35 : vector<1x16x16xbf16> to vector<16x16xbf16>
    %cst_32 = arith.constant dense<0.000000e+00> : vector<32x16xf32>
    %37 = tpu.matmul %34, %36, %cst_32 {dimension_numbers = #tpu.dot_dimension_numbers<[1], [0], [0], [1], [0, 0, 1, 1], [], []>} : vector<32x16xbf16>, vector<16x16xbf16>, vector<32x16xf32> -> vector<32x16xf32>
    %38 = arith.addf %30, %37 : vector<32x16xf32>
    %c3 = arith.constant 3 : index
    %c0_33 = arith.constant 0 : index
    %c0_34 = arith.constant 0 : index
    %39 = vector.load %arg6[%c3, %c0_33, %c0_34] : memref<9x32x32xbf16, #tpu.memory_space<vmem>>, vector<1x32x32xbf16>
    %40 = vector.shape_cast %39 : vector<1x32x32xbf16> to vector<32x32xbf16>
    %cst_35 = arith.constant dense<0.000000e+00> : vector<32x16xf32>
    %41 = tpu.matmul %40, %10, %cst_35 {dimension_numbers = #tpu.dot_dimension_numbers<[1], [0], [0], [1], [0, 0, 1, 1], [], []>} : vector<32x32xbf16>, vector<32x16xbf16>, vector<32x16xf32> -> vector<32x16xf32>
    %42 = arith.truncf %41 : vector<32x16xf32> to vector<32x16xbf16>
    %c3_36 = arith.constant 3 : index
    %c0_37 = arith.constant 0 : index
    %c0_38 = arith.constant 0 : index
    %43 = vector.load %arg4[%c3_36, %c0_37, %c0_38] : memref<9x16x16xbf16, #tpu.memory_space<vmem>>, vector<1x16x16xbf16>
    %44 = vector.shape_cast %43 : vector<1x16x16xbf16> to vector<16x16xbf16>
    %cst_39 = arith.constant dense<0.000000e+00> : vector<32x16xf32>
    %45 = tpu.matmul %42, %44, %cst_39 {dimension_numbers = #tpu.dot_dimension_numbers<[1], [0], [0], [1], [0, 0, 1, 1], [], []>} : vector<32x16xbf16>, vector<16x16xbf16>, vector<32x16xf32> -> vector<32x16xf32>
    %46 = arith.addf %38, %45 : vector<32x16xf32>
    %c4 = arith.constant 4 : index
    %c0_40 = arith.constant 0 : index
    %c0_41 = arith.constant 0 : index
    %47 = vector.load %arg6[%c4, %c0_40, %c0_41] : memref<9x32x32xbf16, #tpu.memory_space<vmem>>, vector<1x32x32xbf16>
    %48 = vector.shape_cast %47 : vector<1x32x32xbf16> to vector<32x32xbf16>
    %cst_42 = arith.constant dense<0.000000e+00> : vector<32x16xf32>
    %49 = tpu.matmul %48, %10, %cst_42 {dimension_numbers = #tpu.dot_dimension_numbers<[1], [0], [0], [1], [0, 0, 1, 1], [], []>} : vector<32x32xbf16>, vector<32x16xbf16>, vector<32x16xf32> -> vector<32x16xf32>
    %50 = arith.truncf %49 : vector<32x16xf32> to vector<32x16xbf16>
    %c4_43 = arith.constant 4 : index
    %c0_44 = arith.constant 0 : index
    %c0_45 = arith.constant 0 : index
    %51 = vector.load %arg4[%c4_43, %c0_44, %c0_45] : memref<9x16x16xbf16, #tpu.memory_space<vmem>>, vector<1x16x16xbf16>
    %52 = vector.shape_cast %51 : vector<1x16x16xbf16> to vector<16x16xbf16>
    %cst_46 = arith.constant dense<0.000000e+00> : vector<32x16xf32>
    %53 = tpu.matmul %50, %52, %cst_46 {dimension_numbers = #tpu.dot_dimension_numbers<[1], [0], [0], [1], [0, 0, 1, 1], [], []>} : vector<32x16xbf16>, vector<16x16xbf16>, vector<32x16xf32> -> vector<32x16xf32>
    %54 = arith.addf %46, %53 : vector<32x16xf32>
    %c5 = arith.constant 5 : index
    %c0_47 = arith.constant 0 : index
    %c0_48 = arith.constant 0 : index
    %55 = vector.load %arg6[%c5, %c0_47, %c0_48] : memref<9x32x32xbf16, #tpu.memory_space<vmem>>, vector<1x32x32xbf16>
    %56 = vector.shape_cast %55 : vector<1x32x32xbf16> to vector<32x32xbf16>
    %cst_49 = arith.constant dense<0.000000e+00> : vector<32x16xf32>
    %57 = tpu.matmul %56, %10, %cst_49 {dimension_numbers = #tpu.dot_dimension_numbers<[1], [0], [0], [1], [0, 0, 1, 1], [], []>} : vector<32x32xbf16>, vector<32x16xbf16>, vector<32x16xf32> -> vector<32x16xf32>
    %58 = arith.truncf %57 : vector<32x16xf32> to vector<32x16xbf16>
    %c5_50 = arith.constant 5 : index
    %c0_51 = arith.constant 0 : index
    %c0_52 = arith.constant 0 : index
    %59 = vector.load %arg4[%c5_50, %c0_51, %c0_52] : memref<9x16x16xbf16, #tpu.memory_space<vmem>>, vector<1x16x16xbf16>
    %60 = vector.shape_cast %59 : vector<1x16x16xbf16> to vector<16x16xbf16>
    %cst_53 = arith.constant dense<0.000000e+00> : vector<32x16xf32>
    %61 = tpu.matmul %58, %60, %cst_53 {dimension_numbers = #tpu.dot_dimension_numbers<[1], [0], [0], [1], [0, 0, 1, 1], [], []>} : vector<32x16xbf16>, vector<16x16xbf16>, vector<32x16xf32> -> vector<32x16xf32>
    %62 = arith.addf %54, %61 : vector<32x16xf32>
    %c6 = arith.constant 6 : index
    %c0_54 = arith.constant 0 : index
    %c0_55 = arith.constant 0 : index
    %63 = vector.load %arg6[%c6, %c0_54, %c0_55] : memref<9x32x32xbf16, #tpu.memory_space<vmem>>, vector<1x32x32xbf16>
    %64 = vector.shape_cast %63 : vector<1x32x32xbf16> to vector<32x32xbf16>
    %cst_56 = arith.constant dense<0.000000e+00> : vector<32x16xf32>
    %65 = tpu.matmul %64, %10, %cst_56 {dimension_numbers = #tpu.dot_dimension_numbers<[1], [0], [0], [1], [0, 0, 1, 1], [], []>} : vector<32x32xbf16>, vector<32x16xbf16>, vector<32x16xf32> -> vector<32x16xf32>
    %66 = arith.truncf %65 : vector<32x16xf32> to vector<32x16xbf16>
    %c6_57 = arith.constant 6 : index
    %c0_58 = arith.constant 0 : index
    %c0_59 = arith.constant 0 : index
    %67 = vector.load %arg4[%c6_57, %c0_58, %c0_59] : memref<9x16x16xbf16, #tpu.memory_space<vmem>>, vector<1x16x16xbf16>
    %68 = vector.shape_cast %67 : vector<1x16x16xbf16> to vector<16x16xbf16>
    %cst_60 = arith.constant dense<0.000000e+00> : vector<32x16xf32>
    %69 = tpu.matmul %66, %68, %cst_60 {dimension_numbers = #tpu.dot_dimension_numbers<[1], [0], [0], [1], [0, 0, 1, 1], [], []>} : vector<32x16xbf16>, vector<16x16xbf16>, vector<32x16xf32> -> vector<32x16xf32>
    %70 = arith.addf %62, %69 : vector<32x16xf32>
    %c7 = arith.constant 7 : index
    %c0_61 = arith.constant 0 : index
    %c0_62 = arith.constant 0 : index
    %71 = vector.load %arg6[%c7, %c0_61, %c0_62] : memref<9x32x32xbf16, #tpu.memory_space<vmem>>, vector<1x32x32xbf16>
    %72 = vector.shape_cast %71 : vector<1x32x32xbf16> to vector<32x32xbf16>
    %cst_63 = arith.constant dense<0.000000e+00> : vector<32x16xf32>
    %73 = tpu.matmul %72, %10, %cst_63 {dimension_numbers = #tpu.dot_dimension_numbers<[1], [0], [0], [1], [0, 0, 1, 1], [], []>} : vector<32x32xbf16>, vector<32x16xbf16>, vector<32x16xf32> -> vector<32x16xf32>
    %74 = arith.truncf %73 : vector<32x16xf32> to vector<32x16xbf16>
    %c7_64 = arith.constant 7 : index
    %c0_65 = arith.constant 0 : index
    %c0_66 = arith.constant 0 : index
    %75 = vector.load %arg4[%c7_64, %c0_65, %c0_66] : memref<9x16x16xbf16, #tpu.memory_space<vmem>>, vector<1x16x16xbf16>
    %76 = vector.shape_cast %75 : vector<1x16x16xbf16> to vector<16x16xbf16>
    %cst_67 = arith.constant dense<0.000000e+00> : vector<32x16xf32>
    %77 = tpu.matmul %74, %76, %cst_67 {dimension_numbers = #tpu.dot_dimension_numbers<[1], [0], [0], [1], [0, 0, 1, 1], [], []>} : vector<32x16xbf16>, vector<16x16xbf16>, vector<32x16xf32> -> vector<32x16xf32>
    %78 = arith.addf %70, %77 : vector<32x16xf32>
    %c8 = arith.constant 8 : index
    %c0_68 = arith.constant 0 : index
    %c0_69 = arith.constant 0 : index
    %79 = vector.load %arg6[%c8, %c0_68, %c0_69] : memref<9x32x32xbf16, #tpu.memory_space<vmem>>, vector<1x32x32xbf16>
    %80 = vector.shape_cast %79 : vector<1x32x32xbf16> to vector<32x32xbf16>
    %cst_70 = arith.constant dense<0.000000e+00> : vector<32x16xf32>
    %81 = tpu.matmul %80, %10, %cst_70 {dimension_numbers = #tpu.dot_dimension_numbers<[1], [0], [0], [1], [0, 0, 1, 1], [], []>} : vector<32x32xbf16>, vector<32x16xbf16>, vector<32x16xf32> -> vector<32x16xf32>
    %82 = arith.truncf %81 : vector<32x16xf32> to vector<32x16xbf16>
    %c8_71 = arith.constant 8 : index
    %c0_72 = arith.constant 0 : index
    %c0_73 = arith.constant 0 : index
    %83 = vector.load %arg4[%c8_71, %c0_72, %c0_73] : memref<9x16x16xbf16, #tpu.memory_space<vmem>>, vector<1x16x16xbf16>
    %84 = vector.shape_cast %83 : vector<1x16x16xbf16> to vector<16x16xbf16>
    %cst_74 = arith.constant dense<0.000000e+00> : vector<32x16xf32>
    %85 = tpu.matmul %82, %84, %cst_74 {dimension_numbers = #tpu.dot_dimension_numbers<[1], [0], [0], [1], [0, 0, 1, 1], [], []>} : vector<32x16xbf16>, vector<16x16xbf16>, vector<32x16xf32> -> vector<32x16xf32>
    %86 = arith.addf %78, %85 : vector<32x16xf32>
    %c0_75 = arith.constant 0 : index
    %c0_76 = arith.constant 0 : index
    %87 = vector.load %arg8[%c0_75, %c0_76] : memref<32x16xf32, #tpu.memory_space<vmem>>, vector<32x16xf32>
    tpu.vector_store %arg8[%c0_75, %c0_76], %86 {strides = array<i32>} : memref<32x16xf32, #tpu.memory_space<vmem>>, vector<32x16xf32>,
    return
  }
  func.func @transform_0(%arg0: i32) -> (i32, i32) {
    %c0_i32 = arith.constant 0 : i32
    %c0_i32_0 = arith.constant 0 : i32
    %c0_i32_1 = arith.constant 0 : i32
    return %c0_i32, %c0_i32_0 : i32, i32
  }
  func.func @transform_1(%arg0: i32) -> (i32, i32) {
    %c0_i32 = arith.constant 0 : i32
    %c0_i32_0 = arith.constant 0 : i32
    %c0_i32_1 = arith.constant 0 : i32
    return %c0_i32, %c0_i32_0 : i32, i32
  }
  func.func @transform_2(%arg0: i32) -> (i32, i32) {
    %c0_i32 = arith.constant 0 : i32
    %c0_i32_0 = arith.constant 0 : i32
    %c0_i32_1 = arith.constant 0 : i32
    return %c0_i32, %c0_i32_0 : i32, i32
  }
  func.func @transform_3(%arg0: i32) -> (i32, i32, i32) {
    %c0_i32 = arith.constant 0 : i32
    %c0_i32_0 = arith.constant 0 : i32
    %c0_i32_1 = arith.constant 0 : i32
    %c0_i32_2 = arith.constant 0 : i32
    return %c0_i32, %c0_i32_0, %c0_i32_1 : i32, i32, i32
  }
  func.func @transform_4(%arg0: i32) -> (i32, i32) {
    %c0_i32 = arith.constant 0 : i32
    %c0_i32_0 = arith.constant 0 : i32
    %c0_i32_1 = arith.constant 0 : i32
    return %c0_i32, %c0_i32_0 : i32, i32
  }
  func.func @transform_5(%arg0: i32) -> (i32, i32, i32) {
    %c0_i32 = arith.constant 0 : i32
    %c0_i32_0 = arith.constant 0 : i32
    %c0_i32_1 = arith.constant 0 : i32
    %c0_i32_2 = arith.constant 0 : i32
    return %c0_i32, %c0_i32_0, %c0_i32_1 : i32, i32, i32
  }
  func.func @transform_6(%arg0: i32) -> (i32, i32) {
    %c0_i32 = arith.constant 0 : i32
    %c0_i32_0 = arith.constant 0 : i32
    %c0_i32_1 = arith.constant 0 : i32
    return %c0_i32, %c0_i32_0 : i32, i32
  }
  func.func @transform_7(%arg0: i32) -> (i32, i32) {
    %c0_i32 = arith.constant 0 : i32
    %c0_i32_0 = arith.constant 0 : i32
    %c0_i32_1 = arith.constant 0 : i32
    return %c0_i32, %c0_i32_0 : i32, i32
  }
}

module attributes {stable_mosaic.version = 11 : i64} {
  func.func @kernel(%arg0: i32, %arg1: memref<32x72xbf16, #tpu.memory_space<vmem>>, %arg2: memref<72x16xbf16, #tpu.memory_space<vmem>>, %arg3: memref<1x16xf32, #tpu.memory_space<vmem>>, %arg4: memref<9x16x16xbf16, #tpu.memory_space<vmem>>, %arg5: memref<1x16xf32, #tpu.memory_space<vmem>>, %arg6: memref<9x32x32xbf16, #tpu.memory_space<vmem>>, %arg7: memref<72x16xbf16, #tpu.memory_space<vmem>>, %arg8: memref<32x16xf32, #tpu.memory_space<vmem>>) attributes {dimension_semantics = [#tpu.dimension_semantics<arbitrary>], iteration_bounds = array<i64: 1>, scalar_prefetch = 0 : i64, scratch_operands = 0 : i64, tpu.core_type = #tpu.core_type<tc>, window_params = [{pipeline_mode = #tpu.pipeline_mode<synchronous>, transform_indices = @transform_0, window_bounds = array<i64: 32, 72>}, {pipeline_mode = #tpu.pipeline_mode<synchronous>, transform_indices = @transform_1, window_bounds = array<i64: 72, 16>}, {pipeline_mode = #tpu.pipeline_mode<synchronous>, transform_indices = @transform_2, window_bounds = array<i64: 1, 16>}, {pipeline_mode = #tpu.pipeline_mode<synchronous>, transform_indices = @transform_3, window_bounds = array<i64: 9, 16, 16>}, {pipeline_mode = #tpu.pipeline_mode<synchronous>, transform_indices = @transform_4, window_bounds = array<i64: 1, 16>}, {pipeline_mode = #tpu.pipeline_mode<synchronous>, transform_indices = @transform_5, window_bounds = array<i64: 9, 32, 32>}, {pipeline_mode = #tpu.pipeline_mode<synchronous>, transform_indices = @transform_6, window_bounds = array<i64: 72, 16>}, {pipeline_mode = #tpu.pipeline_mode<synchronous>, transform_indices = @transform_7, window_bounds = array<i64: 32, 16>}]} {
    %c0 = arith.constant 0 : index
    %c0_0 = arith.constant 0 : index
    %0 = vector.load %arg1[%c0, %c0_0] : memref<32x72xbf16, #tpu.memory_space<vmem>>, vector<32x72xbf16>
    %cst = arith.constant 0.000000e+00 : bf16
    %1 = vector.broadcast %cst : bf16 to vector<32x72xbf16>
    %2 = arith.maximumf %0, %1 : vector<32x72xbf16>
    %c0_1 = arith.constant 0 : index
    %c0_2 = arith.constant 0 : index
    %3 = vector.load %arg2[%c0_1, %c0_2] : memref<72x16xbf16, #tpu.memory_space<vmem>>, vector<72x16xbf16>
    %cst_3 = arith.constant dense<0.000000e+00> : vector<32x16xf32>
    %4 = tpu.matmul %2, %3, %cst_3 {dimension_numbers = #tpu.dot_dimension_numbers<[1], [0], [0], [1], [0, 0, 1, 1], [], []>} : vector<32x72xbf16>, vector<72x16xbf16>, vector<32x16xf32> -> vector<32x16xf32>
    %c0_4 = arith.constant 0 : index
    %c0_5 = arith.constant 0 : index
    %5 = vector.load %arg3[%c0_4, %c0_5] : memref<1x16xf32, #tpu.memory_space<vmem>>, vector<1x16xf32>
    %6 = vector.broadcast %5 : vector<1x16xf32> to vector<32x16xf32>
    %7 = arith.addf %4, %6 : vector<32x16xf32>
    %cst_6 = arith.constant 0.000000e+00 : f32
    %8 = vector.broadcast %cst_6 : f32 to vector<32x16xf32>
    %9 = arith.maximumf %7, %8 : vector<32x16xf32>
    %10 = arith.truncf %9 : vector<32x16xf32> to vector<32x16xbf16>
    %c0_7 = arith.constant 0 : index
    %c0_8 = arith.constant 0 : index
    %11 = vector.load %arg7[%c0_7, %c0_8] : memref<72x16xbf16, #tpu.memory_space<vmem>>, vector<72x16xbf16>
    %cst_9 = arith.constant dense<0.000000e+00> : vector<32x16xf32>
    %12 = tpu.matmul %0, %11, %cst_9 {dimension_numbers = #tpu.dot_dimension_numbers<[1], [0], [0], [1], [0, 0, 1, 1], [], []>} : vector<32x72xbf16>, vector<72x16xbf16>, vector<32x16xf32> -> vector<32x16xf32>
    %c0_10 = arith.constant 0 : index
    %c0_11 = arith.constant 0 : index
    %13 = vector.load %arg5[%c0_10, %c0_11] : memref<1x16xf32, #tpu.memory_space<vmem>>, vector<1x16xf32>
    %14 = vector.broadcast %13 : vector<1x16xf32> to vector<32x16xf32>
    %15 = arith.addf %12, %14 : vector<32x16xf32>
    %c0_12 = arith.constant 0 : index
    %c0_13 = arith.constant 0 : index
    %c0_14 = arith.constant 0 : index
    %16 = vector.load %arg6[%c0_12, %c0_13, %c0_14] : memref<9x32x32xbf16, #tpu.memory_space<vmem>>, vector<1x32x32xbf16>
    %17 = vector.shape_cast %16 : vector<1x32x32xbf16> to vector<32x32xbf16>
    %cst_15 = arith.constant dense<0.000000e+00> : vector<32x16xf32>
    %18 = tpu.matmul %17, %10, %cst_15 {dimension_numbers = #tpu.dot_dimension_numbers<[1], [0], [0], [1], [0, 0, 1, 1], [], []>} : vector<32x32xbf16>, vector<32x16xbf16>, vector<32x16xf32> -> vector<32x16xf32>
    %19 = arith.truncf %18 : vector<32x16xf32> to vector<32x16xbf16>
    %c0_16 = arith.constant 0 : index
    %c0_17 = arith.constant 0 : index
    %c0_18 = arith.constant 0 : index
    %20 = vector.load %arg4[%c0_16, %c0_17, %c0_18] : memref<9x16x16xbf16, #tpu.memory_space<vmem>>, vector<1x16x16xbf16>
    %21 = vector.shape_cast %20 : vector<1x16x16xbf16> to vector<16x16xbf16>
    %cst_19 = arith.constant dense<0.000000e+00> : vector<32x16xf32>
    %22 = tpu.matmul %19, %21, %cst_19 {dimension_numbers = #tpu.dot_dimension_numbers<[1], [0], [0], [1], [0, 0, 1, 1], [], []>} : vector<32x16xbf16>, vector<16x16xbf16>, vector<32x16xf32> -> vector<32x16xf32>
    %23 = arith.addf %15, %22 : vector<32x16xf32>
    %c1 = arith.constant 1 : index
    %c0_20 = arith.constant 0 : index
    %c0_21 = arith.constant 0 : index
    %24 = vector.load %arg6[%c1, %c0_20, %c0_21] : memref<9x32x32xbf16, #tpu.memory_space<vmem>>, vector<1x32x32xbf16>
    %25 = vector.shape_cast %24 : vector<1x32x32xbf16> to vector<32x32xbf16>
    %cst_22 = arith.constant dense<0.000000e+00> : vector<32x16xf32>
    %26 = tpu.matmul %25, %10, %cst_22 {dimension_numbers = #tpu.dot_dimension_numbers<[1], [0], [0], [1], [0, 0, 1, 1], [], []>} : vector<32x32xbf16>, vector<32x16xbf16>, vector<32x16xf32> -> vector<32x16xf32>
    %27 = arith.truncf %26 : vector<32x16xf32> to vector<32x16xbf16>
    %c1_23 = arith.constant 1 : index
    %c0_24 = arith.constant 0 : index
    %c0_25 = arith.constant 0 : index
    %28 = vector.load %arg4[%c1_23, %c0_24, %c0_25] : memref<9x16x16xbf16, #tpu.memory_space<vmem>>, vector<1x16x16xbf16>
    %29 = vector.shape_cast %28 : vector<1x16x16xbf16> to vector<16x16xbf16>
    %cst_26 = arith.constant dense<0.000000e+00> : vector<32x16xf32>
    %30 = tpu.matmul %27, %29, %cst_26 {dimension_numbers = #tpu.dot_dimension_numbers<[1], [0], [0], [1], [0, 0, 1, 1], [], []>} : vector<32x16xbf16>, vector<16x16xbf16>, vector<32x16xf32> -> vector<32x16xf32>
    %31 = arith.addf %23, %30 : vector<32x16xf32>
    %c2 = arith.constant 2 : index
    %c0_27 = arith.constant 0 : index
    %c0_28 = arith.constant 0 : index
    %32 = vector.load %arg6[%c2, %c0_27, %c0_28] : memref<9x32x32xbf16, #tpu.memory_space<vmem>>, vector<1x32x32xbf16>
    %33 = vector.shape_cast %32 : vector<1x32x32xbf16> to vector<32x32xbf16>
    %cst_29 = arith.constant dense<0.000000e+00> : vector<32x16xf32>
    %34 = tpu.matmul %33, %10, %cst_29 {dimension_numbers = #tpu.dot_dimension_numbers<[1], [0], [0], [1], [0, 0, 1, 1], [], []>} : vector<32x32xbf16>, vector<32x16xbf16>, vector<32x16xf32> -> vector<32x16xf32>
    %35 = arith.truncf %34 : vector<32x16xf32> to vector<32x16xbf16>
    %c2_30 = arith.constant 2 : index
    %c0_31 = arith.constant 0 : index
    %c0_32 = arith.constant 0 : index
    %36 = vector.load %arg4[%c2_30, %c0_31, %c0_32] : memref<9x16x16xbf16, #tpu.memory_space<vmem>>, vector<1x16x16xbf16>
    %37 = vector.shape_cast %36 : vector<1x16x16xbf16> to vector<16x16xbf16>
    %cst_33 = arith.constant dense<0.000000e+00> : vector<32x16xf32>
    %38 = tpu.matmul %35, %37, %cst_33 {dimension_numbers = #tpu.dot_dimension_numbers<[1], [0], [0], [1], [0, 0, 1, 1], [], []>} : vector<32x16xbf16>, vector<16x16xbf16>, vector<32x16xf32> -> vector<32x16xf32>
    %39 = arith.addf %31, %38 : vector<32x16xf32>
    %c3 = arith.constant 3 : index
    %c0_34 = arith.constant 0 : index
    %c0_35 = arith.constant 0 : index
    %40 = vector.load %arg6[%c3, %c0_34, %c0_35] : memref<9x32x32xbf16, #tpu.memory_space<vmem>>, vector<1x32x32xbf16>
    %41 = vector.shape_cast %40 : vector<1x32x32xbf16> to vector<32x32xbf16>
    %cst_36 = arith.constant dense<0.000000e+00> : vector<32x16xf32>
    %42 = tpu.matmul %41, %10, %cst_36 {dimension_numbers = #tpu.dot_dimension_numbers<[1], [0], [0], [1], [0, 0, 1, 1], [], []>} : vector<32x32xbf16>, vector<32x16xbf16>, vector<32x16xf32> -> vector<32x16xf32>
    %43 = arith.truncf %42 : vector<32x16xf32> to vector<32x16xbf16>
    %c3_37 = arith.constant 3 : index
    %c0_38 = arith.constant 0 : index
    %c0_39 = arith.constant 0 : index
    %44 = vector.load %arg4[%c3_37, %c0_38, %c0_39] : memref<9x16x16xbf16, #tpu.memory_space<vmem>>, vector<1x16x16xbf16>
    %45 = vector.shape_cast %44 : vector<1x16x16xbf16> to vector<16x16xbf16>
    %cst_40 = arith.constant dense<0.000000e+00> : vector<32x16xf32>
    %46 = tpu.matmul %43, %45, %cst_40 {dimension_numbers = #tpu.dot_dimension_numbers<[1], [0], [0], [1], [0, 0, 1, 1], [], []>} : vector<32x16xbf16>, vector<16x16xbf16>, vector<32x16xf32> -> vector<32x16xf32>
    %47 = arith.addf %39, %46 : vector<32x16xf32>
    %c4 = arith.constant 4 : index
    %c0_41 = arith.constant 0 : index
    %c0_42 = arith.constant 0 : index
    %48 = vector.load %arg6[%c4, %c0_41, %c0_42] : memref<9x32x32xbf16, #tpu.memory_space<vmem>>, vector<1x32x32xbf16>
    %49 = vector.shape_cast %48 : vector<1x32x32xbf16> to vector<32x32xbf16>
    %cst_43 = arith.constant dense<0.000000e+00> : vector<32x16xf32>
    %50 = tpu.matmul %49, %10, %cst_43 {dimension_numbers = #tpu.dot_dimension_numbers<[1], [0], [0], [1], [0, 0, 1, 1], [], []>} : vector<32x32xbf16>, vector<32x16xbf16>, vector<32x16xf32> -> vector<32x16xf32>
    %51 = arith.truncf %50 : vector<32x16xf32> to vector<32x16xbf16>
    %c4_44 = arith.constant 4 : index
    %c0_45 = arith.constant 0 : index
    %c0_46 = arith.constant 0 : index
    %52 = vector.load %arg4[%c4_44, %c0_45, %c0_46] : memref<9x16x16xbf16, #tpu.memory_space<vmem>>, vector<1x16x16xbf16>
    %53 = vector.shape_cast %52 : vector<1x16x16xbf16> to vector<16x16xbf16>
    %cst_47 = arith.constant dense<0.000000e+00> : vector<32x16xf32>
    %54 = tpu.matmul %51, %53, %cst_47 {dimension_numbers = #tpu.dot_dimension_numbers<[1], [0], [0], [1], [0, 0, 1, 1], [], []>} : vector<32x16xbf16>, vector<16x16xbf16>, vector<32x16xf32> -> vector<32x16xf32>
    %55 = arith.addf %47, %54 : vector<32x16xf32>
    %c5 = arith.constant 5 : index
    %c0_48 = arith.constant 0 : index
    %c0_49 = arith.constant 0 : index
    %56 = vector.load %arg6[%c5, %c0_48, %c0_49] : memref<9x32x32xbf16, #tpu.memory_space<vmem>>, vector<1x32x32xbf16>
    %57 = vector.shape_cast %56 : vector<1x32x32xbf16> to vector<32x32xbf16>
    %cst_50 = arith.constant dense<0.000000e+00> : vector<32x16xf32>
    %58 = tpu.matmul %57, %10, %cst_50 {dimension_numbers = #tpu.dot_dimension_numbers<[1], [0], [0], [1], [0, 0, 1, 1], [], []>} : vector<32x32xbf16>, vector<32x16xbf16>, vector<32x16xf32> -> vector<32x16xf32>
    %59 = arith.truncf %58 : vector<32x16xf32> to vector<32x16xbf16>
    %c5_51 = arith.constant 5 : index
    %c0_52 = arith.constant 0 : index
    %c0_53 = arith.constant 0 : index
    %60 = vector.load %arg4[%c5_51, %c0_52, %c0_53] : memref<9x16x16xbf16, #tpu.memory_space<vmem>>, vector<1x16x16xbf16>
    %61 = vector.shape_cast %60 : vector<1x16x16xbf16> to vector<16x16xbf16>
    %cst_54 = arith.constant dense<0.000000e+00> : vector<32x16xf32>
    %62 = tpu.matmul %59, %61, %cst_54 {dimension_numbers = #tpu.dot_dimension_numbers<[1], [0], [0], [1], [0, 0, 1, 1], [], []>} : vector<32x16xbf16>, vector<16x16xbf16>, vector<32x16xf32> -> vector<32x16xf32>
    %63 = arith.addf %55, %62 : vector<32x16xf32>
    %c6 = arith.constant 6 : index
    %c0_55 = arith.constant 0 : index
    %c0_56 = arith.constant 0 : index
    %64 = vector.load %arg6[%c6, %c0_55, %c0_56] : memref<9x32x32xbf16, #tpu.memory_space<vmem>>, vector<1x32x32xbf16>
    %65 = vector.shape_cast %64 : vector<1x32x32xbf16> to vector<32x32xbf16>
    %cst_57 = arith.constant dense<0.000000e+00> : vector<32x16xf32>
    %66 = tpu.matmul %65, %10, %cst_57 {dimension_numbers = #tpu.dot_dimension_numbers<[1], [0], [0], [1], [0, 0, 1, 1], [], []>} : vector<32x32xbf16>, vector<32x16xbf16>, vector<32x16xf32> -> vector<32x16xf32>
    %67 = arith.truncf %66 : vector<32x16xf32> to vector<32x16xbf16>
    %c6_58 = arith.constant 6 : index
    %c0_59 = arith.constant 0 : index
    %c0_60 = arith.constant 0 : index
    %68 = vector.load %arg4[%c6_58, %c0_59, %c0_60] : memref<9x16x16xbf16, #tpu.memory_space<vmem>>, vector<1x16x16xbf16>
    %69 = vector.shape_cast %68 : vector<1x16x16xbf16> to vector<16x16xbf16>
    %cst_61 = arith.constant dense<0.000000e+00> : vector<32x16xf32>
    %70 = tpu.matmul %67, %69, %cst_61 {dimension_numbers = #tpu.dot_dimension_numbers<[1], [0], [0], [1], [0, 0, 1, 1], [], []>} : vector<32x16xbf16>, vector<16x16xbf16>, vector<32x16xf32> -> vector<32x16xf32>
    %71 = arith.addf %63, %70 : vector<32x16xf32>
    %c7 = arith.constant 7 : index
    %c0_62 = arith.constant 0 : index
    %c0_63 = arith.constant 0 : index
    %72 = vector.load %arg6[%c7, %c0_62, %c0_63] : memref<9x32x32xbf16, #tpu.memory_space<vmem>>, vector<1x32x32xbf16>
    %73 = vector.shape_cast %72 : vector<1x32x32xbf16> to vector<32x32xbf16>
    %cst_64 = arith.constant dense<0.000000e+00> : vector<32x16xf32>
    %74 = tpu.matmul %73, %10, %cst_64 {dimension_numbers = #tpu.dot_dimension_numbers<[1], [0], [0], [1], [0, 0, 1, 1], [], []>} : vector<32x32xbf16>, vector<32x16xbf16>, vector<32x16xf32> -> vector<32x16xf32>
    %75 = arith.truncf %74 : vector<32x16xf32> to vector<32x16xbf16>
    %c7_65 = arith.constant 7 : index
    %c0_66 = arith.constant 0 : index
    %c0_67 = arith.constant 0 : index
    %76 = vector.load %arg4[%c7_65, %c0_66, %c0_67] : memref<9x16x16xbf16, #tpu.memory_space<vmem>>, vector<1x16x16xbf16>
    %77 = vector.shape_cast %76 : vector<1x16x16xbf16> to vector<16x16xbf16>
    %cst_68 = arith.constant dense<0.000000e+00> : vector<32x16xf32>
    %78 = tpu.matmul %75, %77, %cst_68 {dimension_numbers = #tpu.dot_dimension_numbers<[1], [0], [0], [1], [0, 0, 1, 1], [], []>} : vector<32x16xbf16>, vector<16x16xbf16>, vector<32x16xf32> -> vector<32x16xf32>
    %79 = arith.addf %71, %78 : vector<32x16xf32>
    %c8 = arith.constant 8 : index
    %c0_69 = arith.constant 0 : index
    %c0_70 = arith.constant 0 : index
    %80 = vector.load %arg6[%c8, %c0_69, %c0_70] : memref<9x32x32xbf16, #tpu.memory_space<vmem>>, vector<1x32x32xbf16>
    %81 = vector.shape_cast %80 : vector<1x32x32xbf16> to vector<32x32xbf16>
    %cst_71 = arith.constant dense<0.000000e+00> : vector<32x16xf32>
    %82 = tpu.matmul %81, %10, %cst_71 {dimension_numbers = #tpu.dot_dimension_numbers<[1], [0], [0], [1], [0, 0, 1, 1], [], []>} : vector<32x32xbf16>, vector<32x16xbf16>, vector<32x16xf32> -> vector<32x16xf32>
    %83 = arith.truncf %82 : vector<32x16xf32> to vector<32x16xbf16>
    %c8_72 = arith.constant 8 : index
    %c0_73 = arith.constant 0 : index
    %c0_74 = arith.constant 0 : index
    %84 = vector.load %arg4[%c8_72, %c0_73, %c0_74] : memref<9x16x16xbf16, #tpu.memory_space<vmem>>, vector<1x16x16xbf16>
    %85 = vector.shape_cast %84 : vector<1x16x16xbf16> to vector<16x16xbf16>
    %cst_75 = arith.constant dense<0.000000e+00> : vector<32x16xf32>
    %86 = tpu.matmul %83, %85, %cst_75 {dimension_numbers = #tpu.dot_dimension_numbers<[1], [0], [0], [1], [0, 0, 1, 1], [], []>} : vector<32x16xbf16>, vector<16x16xbf16>, vector<32x16xf32> -> vector<32x16xf32>
    %87 = arith.addf %79, %86 : vector<32x16xf32>
    %c0_76 = arith.constant 0 : index
    %c0_77 = arith.constant 0 : index
    %88 = vector.load %arg8[%c0_76, %c0_77] : memref<32x16xf32, #tpu.memory_space<vmem>>, vector<32x16xf32>
    tpu.vector_store %arg8[%c0_76, %c0_77], %87 {strides = array<i32>} : memref<32x16xf32, #tpu.memory_space<vmem>>, vector<32x16xf32>,
    return
  }
  func.func @transform_0(%arg0: i32) -> (i32, i32) {
    %c0_i32 = arith.constant 0 : i32
    %c0_i32_0 = arith.constant 0 : i32
    %c0_i32_1 = arith.constant 0 : i32
    return %c0_i32, %c0_i32_0 : i32, i32
  }
  func.func @transform_1(%arg0: i32) -> (i32, i32) {
    %c0_i32 = arith.constant 0 : i32
    %c0_i32_0 = arith.constant 0 : i32
    %c0_i32_1 = arith.constant 0 : i32
    return %c0_i32, %c0_i32_0 : i32, i32
  }
  func.func @transform_2(%arg0: i32) -> (i32, i32) {
    %c0_i32 = arith.constant 0 : i32
    %c0_i32_0 = arith.constant 0 : i32
    %c0_i32_1 = arith.constant 0 : i32
    return %c0_i32, %c0_i32_0 : i32, i32
  }
  func.func @transform_3(%arg0: i32) -> (i32, i32, i32) {
    %c0_i32 = arith.constant 0 : i32
    %c0_i32_0 = arith.constant 0 : i32
    %c0_i32_1 = arith.constant 0 : i32
    %c0_i32_2 = arith.constant 0 : i32
    return %c0_i32, %c0_i32_0, %c0_i32_1 : i32, i32, i32
  }
  func.func @transform_4(%arg0: i32) -> (i32, i32) {
    %c0_i32 = arith.constant 0 : i32
    %c0_i32_0 = arith.constant 0 : i32
    %c0_i32_1 = arith.constant 0 : i32
    return %c0_i32, %c0_i32_0 : i32, i32
  }
  func.func @transform_5(%arg0: i32) -> (i32, i32, i32) {
    %c0_i32 = arith.constant 0 : i32
    %c0_i32_0 = arith.constant 0 : i32
    %c0_i32_1 = arith.constant 0 : i32
    %c0_i32_2 = arith.constant 0 : i32
    return %c0_i32, %c0_i32_0, %c0_i32_1 : i32, i32, i32
  }
  func.func @transform_6(%arg0: i32) -> (i32, i32) {
    %c0_i32 = arith.constant 0 : i32
    %c0_i32_0 = arith.constant 0 : i32
    %c0_i32_1 = arith.constant 0 : i32
    return %c0_i32, %c0_i32_0 : i32, i32
  }
  func.func @transform_7(%arg0: i32) -> (i32, i32) {
    %c0_i32 = arith.constant 0 : i32
    %c0_i32_0 = arith.constant 0 : i32
    %c0_i32_1 = arith.constant 0 : i32
    return %c0_i32, %c0_i32_0 : i32, i32
  }
}

module attributes {stable_mosaic.version = 11 : i64} {
  func.func @_pool_head_kernel(%arg0: i32, %arg1: memref<32x16xbf16, #tpu.memory_space<vmem>>, %arg2: memref<2x32xbf16, #tpu.memory_space<vmem>>, %arg3: memref<16x10xbf16, #tpu.memory_space<vmem>>, %arg4: memref<1x10xf32, #tpu.memory_space<vmem>>, %arg5: memref<2x10xf32, #tpu.memory_space<vmem>>) attributes {dimension_semantics = [#tpu.dimension_semantics<arbitrary>], iteration_bounds = array<i64: 1>, scalar_prefetch = 0 : i64, scratch_operands = 0 : i64, tpu.core_type = #tpu.core_type<tc>, window_params = [{pipeline_mode = #tpu.pipeline_mode<synchronous>, transform_indices = @transform_0, window_bounds = array<i64: 32, 16>}, {pipeline_mode = #tpu.pipeline_mode<synchronous>, transform_indices = @transform_1, window_bounds = array<i64: 2, 32>}, {pipeline_mode = #tpu.pipeline_mode<synchronous>, transform_indices = @transform_2, window_bounds = array<i64: 16, 10>}, {pipeline_mode = #tpu.pipeline_mode<synchronous>, transform_indices = @transform_3, window_bounds = array<i64: 1, 10>}, {pipeline_mode = #tpu.pipeline_mode<synchronous>, transform_indices = @transform_4, window_bounds = array<i64: 2, 10>}]} {
    %c0 = arith.constant 0 : index
    %c0_0 = arith.constant 0 : index
    %0 = vector.load %arg2[%c0, %c0_0] : memref<2x32xbf16, #tpu.memory_space<vmem>>, vector<2x32xbf16>
    %c0_1 = arith.constant 0 : index
    %c0_2 = arith.constant 0 : index
    %1 = vector.load %arg1[%c0_1, %c0_2] : memref<32x16xbf16, #tpu.memory_space<vmem>>, vector<32x16xbf16>
    %cst = arith.constant dense<0.000000e+00> : vector<2x16xf32>
    %2 = tpu.matmul %0, %1, %cst {dimension_numbers = #tpu.dot_dimension_numbers<[1], [0], [0], [1], [0, 0, 1, 1], [], []>} : vector<2x32xbf16>, vector<32x16xbf16>, vector<2x16xf32> -> vector<2x16xf32>
    %3 = arith.truncf %2 : vector<2x16xf32> to vector<2x16xbf16>
    %c0_3 = arith.constant 0 : index
    %c0_4 = arith.constant 0 : index
    %4 = vector.load %arg3[%c0_3, %c0_4] : memref<16x10xbf16, #tpu.memory_space<vmem>>, vector<16x10xbf16>
    %cst_5 = arith.constant dense<0.000000e+00> : vector<2x10xf32>
    %5 = tpu.matmul %3, %4, %cst_5 {dimension_numbers = #tpu.dot_dimension_numbers<[1], [0], [0], [1], [0, 0, 1, 1], [], []>} : vector<2x16xbf16>, vector<16x10xbf16>, vector<2x10xf32> -> vector<2x10xf32>
    %c0_6 = arith.constant 0 : index
    %c0_7 = arith.constant 0 : index
    %6 = vector.load %arg4[%c0_6, %c0_7] : memref<1x10xf32, #tpu.memory_space<vmem>>, vector<1x10xf32>
    %7 = vector.broadcast %6 : vector<1x10xf32> to vector<2x10xf32>
    %8 = arith.addf %5, %7 : vector<2x10xf32>
    %c0_8 = arith.constant 0 : index
    %c0_9 = arith.constant 0 : index
    %9 = vector.load %arg5[%c0_8, %c0_9] : memref<2x10xf32, #tpu.memory_space<vmem>>, vector<2x10xf32>
    tpu.vector_store %arg5[%c0_8, %c0_9], %8 {strides = array<i32>} : memref<2x10xf32, #tpu.memory_space<vmem>>, vector<2x10xf32>,
    return
  }
  func.func @transform_0(%arg0: i32) -> (i32, i32) {
    %c0_i32 = arith.constant 0 : i32
    %c0_i32_0 = arith.constant 0 : i32
    %c0_i32_1 = arith.constant 0 : i32
    return %c0_i32, %c0_i32_0 : i32, i32
  }
  func.func @transform_1(%arg0: i32) -> (i32, i32) {
    %c0_i32 = arith.constant 0 : i32
    %c0_i32_0 = arith.constant 0 : i32
    %c0_i32_1 = arith.constant 0 : i32
    return %c0_i32, %c0_i32_0 : i32, i32
  }
  func.func @transform_2(%arg0: i32) -> (i32, i32) {
    %c0_i32 = arith.constant 0 : i32
    %c0_i32_0 = arith.constant 0 : i32
    %c0_i32_1 = arith.constant 0 : i32
    return %c0_i32, %c0_i32_0 : i32, i32
  }
  func.func @transform_3(%arg0: i32) -> (i32, i32) {
    %c0_i32 = arith.constant 0 : i32
    %c0_i32_0 = arith.constant 0 : i32
    %c0_i32_1 = arith.constant 0 : i32
    return %c0_i32, %c0_i32_0 : i32, i32
  }
  func.func @transform_4(%arg0: i32) -> (i32, i32) {
    %c0_i32 = arith.constant 0 : i32
    %c0_i32_0 = arith.constant 0 : i32
    %c0_i32_1 = arith.constant 0 : i32
    return %c0_i32, %c0_i32_0 : i32, i32
  }
}

</mosaic_0001>

<bundles_post_ra>
// kernel: _lambda_.7
= control target key start
LH: loop header
LB: loop body
LE: loop exit
PB: predicated region body
PF: predicated region fallthrough
CT: control target
= control target key end

     0   :  { %s775_s12 = smov 0   ;;  %s939_s0 = inlined_call_operand.vmem [shape: bf16[512,27], index: 0, kind: input, shape index: {}]   ;;  %s940_s1 = inlined_call_operand.vmem [shape: bf16[27,4], index: 1, kind: input, shape index: {}]   ;;  %s941_s2 = inlined_call_operand.vmem [shape: f32[1,4], index: 2, kind: input, shape index: {}]   ;;  %s942_s3 = inlined_call_operand.vmem [shape: f32[512,4], index: 3, kind: output, shape index: {}]  }
   0x1 LB: > { %s615_s13 = sadd.s32 4294967295, %s752_s12   ;;  %p619_p0 = scmp.ge.s32.totalorder %s752_s12, 1  ;;  %s752_s12 = sphi %s775_s12, %s13_s12  }
   0x2   : > { %p138_p1 = scmp.lt.s32.totalorder %s752_s12, 3 }
   0x4   : > { %p139_p2 = pnand %p619_p0, %p138_p1 }
   0x5   : > { %v728_v0 = vld [vmem:[%s940_s1] sm:$0xff] (!%p139_p2)   ;;  %vm358_vm0 = vcmask (!%p139_p2), 1044480   ;;  %v729_v1 = vld [vmem:[%s940_s1 + $0x8] sm:$0x3f] (!%p139_p2)   ;;  %vm359_vm1 = vcmask (!%p139_p2), 1045504   ;;  %s620_s18 = sshll.u32 (!%p139_p2), %s615_s13, 5 }
   0x6   : > { %142 = sbr.rel (%p139_p2) target bundleno = 261 (0x105), region = 32  ;;  %679 = vmatprep.subr.bf16.mxu0 (!%p139_p2), %v728_v0  ;;  %715 = vmatprep.subr.bf16.mxu1 (!%p139_p2), %v728_v0  ;;  %v754_v2 = vmov (!%p139_p2), 65535   ;;  %p163_p3 = scmp.lt.s32.totalorder (!%p139_p2), %s620_s18, 63  ;;  %vm309_vm2 = vcmask (!%p139_p2), 220160   ;;  %v833_v22 = vld [vmem:[%s941_s2] ss:$0 sm:$0xff] (!%p139_p2) }
   0x7   : > { %680 = vmatpush3.bf16.msra.mxu0 (!%p139_p2), %v728_v0  ;;  %717 = vmatpush3.bf16.msra.mxu1 (!%p139_p2), %v728_v0  ;;  %v360_v3 = vsel (!%p139_p2), %vm358_vm0, 4294967295, %v754_v2  ;;  %vm526_vm3 = vcmask (!%p139_p2), 31744  }
   0x8   : > { %v361_v4 = vsel (!%p139_p2), %vm359_vm1, %v360_v3, 0 }
   0x9   : > { %v363_v5 = vand.u32 (!%p139_p2), %v729_v1, %v361_v4 }
   0xb   : > { %681 = vmatprep.subr.bf16.mxu0 (!%p139_p2), %v363_v5  ;;  %716 = vmatprep.subr.bf16.mxu1 (!%p139_p2), %v363_v5 }
   0xc   : > { %682 = vmatpush3.bf16.msra.mxu0 (!%p139_p2), %v363_v5  ;;  %718 = vmatpush3.bf16.msra.mxu1 (!%p139_p2), %v363_v5 }
   0xd   : > { %s944_s18 = smov (!%p163_p3, %s620_s18), 63 }
   0xe   : > { %s621_s19 = sshll.u32 %s944_s18, 2  ;;  %s623_s23 = sshll.u32 %s944_s18, 3 }
   0xf   : > { %s795_s22 = scalar_lea.vmem %s939_s0, %s621_s19  ;;  %s838_s28 = scalar_lea.vmem %s942_s3, %s623_s23 }
  0x10   : > { %v730_v6 = vld [vmem:[%s795_s22] sm:$0xff]   ;;  %v732_v8 = vld [vmem:[%s795_s22 + $0x8] sm:$0xff]   ;;  %v734_v10 = vld [vmem:[%s795_s22 + $0x10] sm:$0xff]  }
  0x11   : > { %v731_v7 = vld [vmem:[%s795_s22 + $0x40] sm:$0xff]   ;;  %683 = vmatprep.mubr.msk.bf16.mxu0 %vm309_vm2, %v730_v6  ;;  %v733_v9 = vld [vmem:[%s795_s22 + $0x48] sm:$0xff]   ;;  %v735_v11 = vld [vmem:[%s795_s22 + $0x50] sm:$0xff]  }
  0x12   : > { %699 = vmatprep.mubr.msk.bf16.mxu1 %vm309_vm2, %v731_v7  ;;  %684 = vmatmul.mubr.msk.bf16.vlgmr.msra.gmra.mrb[0].mxu0 %vm309_vm2, %v732_v8  ;;  %v736_v12 = vld [vmem:[%s795_s22 + $0x18] sm:$0xff]   ;;  %v738_v14 = vld [vmem:[%s795_s22 + $0x20] sm:$0xff]   ;;  %v740_v16 = vld [vmem:[%s795_s22 + $0x28] sm:$0xff]  }
  0x13   : > { %700 = vmatmul.mubr.msk.bf16.vlgmr.msra.gmra.mrb[0].mxu1 %vm309_vm2, %v733_v9  ;;  %687 = vmatprep.mubr.msk.bf16.mxu0 %vm309_vm2, %v734_v10  ;;  %v737_v13 = vld [vmem:[%s795_s22 + $0x58] sm:$0xff]   ;;  %v739_v15 = vld [vmem:[%s795_s22 + $0x60] sm:$0xff]   ;;  %v741_v17 = vld [vmem:[%s795_s22 + $0x68] sm:$0xff]  }
  0x14   : > { %703 = vmatprep.mubr.msk.bf16.mxu1 %vm309_vm2, %v735_v11  ;;  %v742_v18 = vld [vmem:[%s795_s22 + $0x30] sm:$0xff]   ;;  %v744_v20 = vld [vmem:[%s795_s22 + $0x38] sm:$0xff]  }
  0x15   : > { %v743_v19 = vld [vmem:[%s795_s22 + $0x70] sm:$0xff]   ;;  %v745_v21 = vld [vmem:[%s795_s22 + $0x78] sm:$0xff]  }
  0x1a   : > { %688 = vmatmul.mubr.msk.bf16.gmra.mrb[4].mxu0 %vm309_vm2, %v736_v12 }
  0x1b   : > { %704 = vmatmul.mubr.msk.bf16.gmra.mrb[4].mxu1 %vm309_vm2, %v737_v13  ;;  %691 = vmatprep.mubr.msk.bf16.mxu0 %vm309_vm2, %v738_v14 }
  0x1c   : > { %707 = vmatprep.mubr.msk.bf16.mxu1 %vm309_vm2, %v739_v15 }
  0x22   : > { %692 = vmatmul.mubr.msk.bf16.gmra.mrb[8].mxu0 %vm309_vm2, %v740_v16 }
  0x23   : > { %708 = vmatmul.mubr.msk.bf16.gmra.mrb[8].mxu1 %vm309_vm2, %v741_v17  ;;  %695 = vmatprep.mubr.msk.bf16.mxu0 %vm309_vm2, %v742_v18 }
  0x24   : > { %711 = vmatprep.mubr.msk.bf16.mxu1 %vm309_vm2, %v743_v19 }
  0x2a   : > { %696 = vmatmul.mubr.msk.bf16.gmra.mrb[12].mxu0 %vm309_vm2, %v744_v20 }
  0x2b   : > { %712 = vmatmul.mubr.msk.bf16.gmra.mrb[12].mxu1 %vm309_vm2, %v745_v21 }
  0xe5   : > { %v685_v23 = vpop.f32.mrb[0].mxu0 }
  0xe6   : > { %v408_v24 = vadd.f32 %v685_v23, %v833_v22  ;;  %v701_v25 = vpop.f32.mrb[0].mxu1  ;;  %v399_v26 = vpop.f32.mrb[1].mxu0 }
  0xe7   : > { %v472_v27 = vadd.f32 %v701_v25, %v833_v22  ;;  %v400_v28 = vadd.f32 %v833_v22, %v399_v26  ;;  %v463_v29 = vpop.f32.mrb[1].mxu1  ;;  %v686_v30 = vpop.f32.mrb[2].mxu0 }
  0xe8   : > { %529 = vst.msk [vmem:[%s838_s28 + $0x10] sm:$0xff] %vm526_vm3, %v408_v24  ;;  %v464_v31 = vadd.f32 %v833_v22, %v463_v29  ;;  %v411_v32 = vadd.f32 %v686_v30, %v833_v22  ;;  %v702_v33 = vpop.f32.mrb[2].mxu1  ;;  %v402_v34 = vpop.f32.mrb[3].mxu0 }
  0xe9   : > { %545 = vst.msk [vmem:[%s838_s28 + $0x90] sm:$0xff] %vm526_vm3, %v472_v27  ;;  %527 = vst.msk [vmem:[%s838_s28] sm:$0xff] %vm526_vm3, %v400_v28  ;;  %v475_v35 = vadd.f32 %v702_v33, %v833_v22  ;;  %v403_v36 = vadd.f32 %v833_v22, %v402_v34  ;;  %v466_v37 = vpop.f32.mrb[3].mxu1 }
  0xea   : > { %543 = vst.msk [vmem:[%s838_s28 + $0x80] sm:$0xff] %vm526_vm3, %v464_v31  ;;  %530 = vst.msk [vmem:[%s838_s28 + $0x18] sm:$0xff] %vm526_vm3, %v411_v32  ;;  %v467_v38 = vadd.f32 %v833_v22, %v466_v37 }
  0xeb   : > { %546 = vst.msk [vmem:[%s838_s28 + $0x98] sm:$0xff] %vm526_vm3, %v475_v35  ;;  %528 = vst.msk [vmem:[%s838_s28 + $0x8] sm:$0xff] %vm526_vm3, %v403_v36 }
  0xec   : > { %544 = vst.msk [vmem:[%s838_s28 + $0x88] sm:$0xff] %vm526_vm3, %v467_v38 }
  0xed   : > { %v689_v39 = vpop.f32.mrb[4].mxu0 }
  0xee   : > { %v424_v40 = vadd.f32 %v689_v39, %v833_v22  ;;  %v705_v41 = vpop.f32.mrb[4].mxu1  ;;  %v415_v42 = vpop.f32.mrb[5].mxu0 }
  0xef   : > { %v488_v43 = vadd.f32 %v705_v41, %v833_v22  ;;  %v416_v44 = vadd.f32 %v833_v22, %v415_v42  ;;  %v479_v45 = vpop.f32.mrb[5].mxu1  ;;  %v690_v46 = vpop.f32.mrb[6].mxu0 }
  0xf0   : > { %533 = vst.msk [vmem:[%s838_s28 + $0x30] sm:$0xff] %vm526_vm3, %v424_v40  ;;  %v480_v47 = vadd.f32 %v833_v22, %v479_v45  ;;  %v427_v48 = vadd.f32 %v690_v46, %v833_v22  ;;  %v706_v49 = vpop.f32.mrb[6].mxu1  ;;  %v418_v50 = vpop.f32.mrb[7].mxu0 }
  0xf1   : > { %549 = vst.msk [vmem:[%s838_s28 + $0xb0] sm:$0xff] %vm526_vm3, %v488_v43  ;;  %531 = vst.msk [vmem:[%s838_s28 + $0x20] sm:$0xff] %vm526_vm3, %v416_v44  ;;  %v491_v51 = vadd.f32 %v706_v49, %v833_v22  ;;  %v419_v52 = vadd.f32 %v833_v22, %v418_v50  ;;  %v482_v53 = vpop.f32.mrb[7].mxu1 }
  0xf2   : > { %547 = vst.msk [vmem:[%s838_s28 + $0xa0] sm:$0xff] %vm526_vm3, %v480_v47  ;;  %534 = vst.msk [vmem:[%s838_s28 + $0x38] sm:$0xff] %vm526_vm3, %v427_v48  ;;  %v483_v54 = vadd.f32 %v833_v22, %v482_v53 }
  0xf3   : > { %550 = vst.msk [vmem:[%s838_s28 + $0xb8] sm:$0xff] %vm526_vm3, %v491_v51  ;;  %532 = vst.msk [vmem:[%s838_s28 + $0x28] sm:$0xff] %vm526_vm3, %v419_v52 }
  0xf4   : > { %548 = vst.msk [vmem:[%s838_s28 + $0xa8] sm:$0xff] %vm526_vm3, %v483_v54 }
  0xf5   : > { %v693_v55 = vpop.f32.mrb[8].mxu0 }
  0xf6   : > { %v440_v56 = vadd.f32 %v693_v55, %v833_v22  ;;  %v709_v57 = vpop.f32.mrb[8].mxu1  ;;  %v431_v58 = vpop.f32.mrb[9].mxu0 }
  0xf7   : > { %v504_v59 = vadd.f32 %v709_v57, %v833_v22  ;;  %v432_v60 = vadd.f32 %v833_v22, %v431_v58  ;;  %v495_v61 = vpop.f32.mrb[9].mxu1  ;;  %v694_v62 = vpop.f32.mrb[10].mxu0 }
  0xf8   : > { %537 = vst.msk [vmem:[%s838_s28 + $0x50] sm:$0xff] %vm526_vm3, %v440_v56  ;;  %v496_v63 = vadd.f32 %v833_v22, %v495_v61  ;;  %v443_v0 = vadd.f32 %v694_v62, %v833_v22  ;;  %v710_v1 = vpop.f32.mrb[10].mxu1  ;;  %v434_v2 = vpop.f32.mrb[11].mxu0 }
  0xf9   : > { %553 = vst.msk [vmem:[%s838_s28 + $0xd0] sm:$0xff] %vm526_vm3, %v504_v59  ;;  %535 = vst.msk [vmem:[%s838_s28 + $0x40] sm:$0xff] %vm526_vm3, %v432_v60  ;;  %v507_v3 = vadd.f32 %v710_v1, %v833_v22  ;;  %v435_v4 = vadd.f32 %v833_v22, %v434_v2  ;;  %v498_v5 = vpop.f32.mrb[11].mxu1 }
  0xfa   : > { %551 = vst.msk [vmem:[%s838_s28 + $0xc0] sm:$0xff] %vm526_vm3, %v496_v63  ;;  %538 = vst.msk [vmem:[%s838_s28 + $0x58] sm:$0xff] %vm526_vm3, %v443_v0  ;;  %v499_v6 = vadd.f32 %v833_v22, %v498_v5 }
  0xfb   : > { %554 = vst.msk [vmem:[%s838_s28 + $0xd8] sm:$0xff] %vm526_vm3, %v507_v3  ;;  %536 = vst.msk [vmem:[%s838_s28 + $0x48] sm:$0xff] %vm526_vm3, %v435_v4 }
  0xfc   : > { %552 = vst.msk [vmem:[%s838_s28 + $0xc8] sm:$0xff] %vm526_vm3, %v499_v6 }
  0xfd   : > { %v697_v7 = vpop.f32.mrb[12].mxu0 }
  0xfe   : > { %v456_v8 = vadd.f32 %v697_v7, %v833_v22  ;;  %v713_v9 = vpop.f32.mrb[12].mxu1  ;;  %v447_v10 = vpop.f32.mrb[13].mxu0 }
  0xff   : > { %v520_v11 = vadd.f32 %v713_v9, %v833_v22  ;;  %v448_v12 = vadd.f32 %v833_v22, %v447_v10  ;;  %v511_v13 = vpop.f32.mrb[13].mxu1  ;;  %v698_v14 = vpop.f32.mrb[14].mxu0 }
 0x100   : > { %541 = vst.msk [vmem:[%s838_s28 + $0x70] sm:$0xff] %vm526_vm3, %v456_v8  ;;  %v512_v15 = vadd.f32 %v833_v22, %v511_v13  ;;  %v459_v16 = vadd.f32 %v698_v14, %v833_v22  ;;  %v714_v17 = vpop.f32.mrb[14].mxu1  ;;  %v450_v18 = vpop.f32.mrb[15].mxu0 }
 0x101   : > { %557 = vst.msk [vmem:[%s838_s28 + $0xf0] sm:$0xff] %vm526_vm3, %v520_v11  ;;  %539 = vst.msk [vmem:[%s838_s28 + $0x60] sm:$0xff] %vm526_vm3, %v448_v12  ;;  %v523_v19 = vadd.f32 %v714_v17, %v833_v22  ;;  %v451_v20 = vadd.f32 %v833_v22, %v450_v18  ;;  %v514_v21 = vpop.f32.mrb[15].mxu1 }
 0x102   : > { %555 = vst.msk [vmem:[%s838_s28 + $0xe0] sm:$0xff] %vm526_vm3, %v512_v15  ;;  %542 = vst.msk [vmem:[%s838_s28 + $0x78] sm:$0xff] %vm526_vm3, %v459_v16  ;;  %v515_v23 = vadd.f32 %v833_v22, %v514_v21 }
 0x103   : > { %558 = vst.msk [vmem:[%s838_s28 + $0xf8] sm:$0xff] %vm526_vm3, %v523_v19  ;;  %540 = vst.msk [vmem:[%s838_s28 + $0x68] sm:$0xff] %vm526_vm3, %v451_v20 }
 0x104   : > { %556 = vst.msk [vmem:[%s838_s28 + $0xe8] sm:$0xff] %vm526_vm3, %v515_v23 }
 0x105 PF: > { %s13_s12 = sadd.s32 1, %s752_s12  }
 0x106   : > { %p10_p4 = scmp.ge.s32.totalorder %s13_s12, 4  }
 0x108   :  { %12 = sbr.rel (!%p10_p4) target bundleno = 1 (0x1), region = 62 }

// kernel: _lambda_.8
= control target key start
LH: loop header
LB: loop body
LE: loop exit
PB: predicated region body
PF: predicated region fallthrough
CT: control target
= control target key end

     0   :  { %vm139_vm0 = vcmask 1041408   ;;  %v326_v6 = vmov 0   ;;  %vm114_vm1 = vcmask 293888   ;;  %vm240_vm2 = vcmask 64512   ;;  %s482_s1 = inlined_call_operand.vmem [shape: bf16[36,8], index: 1, kind: input, shape index: {}]   ;;  %s483_s0 = inlined_call_operand.vmem [shape: bf16[128,36], index: 0, kind: input, shape index: {}]   ;;  %s484_s2 = inlined_call_operand.vmem [shape: f32[1,8], index: 2, kind: input, shape index: {}]   ;;  %s485_s3 = inlined_call_operand.vmem [shape: f32[128,8], index: 3, kind: output, shape index: {}]  }
   0x1   :  { %v323_v0 = vld [vmem:[%s482_s1] sm:$0xff]   ;;  %v324_v1 = vld [vmem:[%s482_s1 + $0x8] sm:$0xff]   ;;  %v325_v2 = vld [vmem:[%s482_s1 + $0x10] ss:$0 sps:$4 sm:$0x33]  }
   0x2   :  { %292 = vmatprep.subr.bf16.mxu0 %v323_v0  ;;  %314 = vmatprep.subr.bf16.mxu1 %v323_v0  ;;  %v15_v3 = vld [vmem:[%s483_s0] sm:$0xf]  ;;  %v16_v4 = vld [vmem:[%s483_s0 + $0x4] sm:$0xf]  ;;  %v17_v11 = vld [vmem:[%s483_s0 + $0x8] sm:$0xf] }
   0x3   :  { %293 = vmatpush3.bf16.msra.mxu0 %v323_v0  ;;  %317 = vmatpush3.bf16.msra.mxu1 %v323_v0  ;;  %v23_v5 = vld [vmem:[%s483_s0 + $0x20] sm:$0xf]  ;;  %v31_v7 = vmax.bf16 %v326_v6, %v15_v3  ;;  %v32_v8 = vmax.bf16 %v326_v6, %v16_v4  ;;  %v24_v9 = vld [vmem:[%s483_s0 + $0x24] sm:$0xf]  ;;  %v18_v13 = vld [vmem:[%s483_s0 + $0xc] sm:$0xf]  ;;  %v33_v14 = vmax.bf16 %v326_v6, %v17_v11 }
   0x4   :  { %294 = vmatprep.subr.bf16.mxu0 %v324_v1  ;;  %315 = vmatprep.subr.bf16.mxu1 %v324_v1  ;;  %v39_v10 = vmax.bf16 %v326_v6, %v23_v5  ;;  %v40_v12 = vmax.bf16 %v326_v6, %v24_v9  ;;  %v25_v15 = vld [vmem:[%s483_s0 + $0x28] sm:$0xf]  ;;  %v26_v16 = vld [vmem:[%s483_s0 + $0x2c] sm:$0xf]  ;;  %v34_v18 = vmax.bf16 %v326_v6, %v18_v13  ;;  %v19_v21 = vld [vmem:[%s483_s0 + $0x10] sm:$0xf] }
   0x5   :  { %v262_v17 = vcombine.low %v31_v7, %v32_v8  ;;  %v41_v19 = vmax.bf16 %v326_v6, %v25_v15  ;;  %v42_v20 = vmax.bf16 %v326_v6, %v26_v16  ;;  %v20_v22 = vld [vmem:[%s483_s0 + $0x14] sm:$0xf]  ;;  %v27_v23 = vld [vmem:[%s483_s0 + $0x30] sm:$0xf]  ;;  %v35_v25 = vmax.bf16 %v326_v6, %v19_v21  ;;  %v21_v33 = vld [vmem:[%s483_s0 + $0x18] sm:$0xf] }
   0x6   :  { %v266_v24 = vcombine.low %v39_v10, %v40_v12  ;;  %v36_v26 = vmax.bf16 %v326_v6, %v20_v22  ;;  %v28_v27 = vld [vmem:[%s483_s0 + $0x34] sm:$0xf]  ;;  %v141_v28 = vsel %vm139_vm0, %v325_v2, 0  ;;  %v43_v29 = vmax.bf16 %v326_v6, %v27_v23  ;;  %v22_v36 = vld [vmem:[%s483_s0 + $0x1c] sm:$0xf] }
   0x7   :  { %295 = vmatpush3.bf16.msra.mxu0 %v324_v1  ;;  %318 = vmatpush3.bf16.msra.mxu1 %v324_v1  ;;  %v44_v30 = vmax.bf16 %v326_v6, %v28_v27  ;;  %v263_v31 = vcombine.low %v33_v14, %v34_v18  ;;  %v267_v32 = vcombine.low %v41_v19, %v42_v20  ;;  %v29_v37 = vld [vmem:[%s483_s0 + $0x38] sm:$0xf]  ;;  %v30_v38 = vld [vmem:[%s483_s0 + $0x3c] sm:$0xf]  ;;  %v261_v45 = vld [vmem:[%s484_s2] ss:$0 sm:$0xff] }
   0x8   :  { %320 = vmatprep.subr.msk.bf16.mxu0 %vm139_vm0, %v325_v2  ;;  %321 = vmatprep.subr.msk.bf16.mxu1 %vm139_vm0, %v325_v2  ;;  %v264_v34 = vcombine.low %v35_v25, %v36_v26  ;;  %v37_v39 = vmax.bf16 %v326_v6, %v21_v33  ;;  %v38_v40 = vmax.bf16 %v326_v6, %v22_v36 }
   0x9   :  { %298 = vmatprep.mubr.msk.bf16.mxu0 %vm114_vm1, %v262_v17  ;;  %306 = vmatprep.mubr.msk.bf16.mxu1 %vm114_vm1, %v266_v24  ;;  %v268_v35 = vcombine.low %v43_v29, %v44_v30  ;;  %v45_v41 = vmax.bf16 %v326_v6, %v29_v37  ;;  %v46_v42 = vmax.bf16 %v326_v6, %v30_v38 }
   0xa   :  { %v265_v43 = vcombine.low %v37_v39, %v38_v40 }
   0xb   :  { %297 = vmatpush3.bf16.msra.mxu0 %v141_v28  ;;  %319 = vmatpush3.bf16.msra.mxu1 %v141_v28  ;;  %v269_v44 = vcombine.low %v45_v41, %v46_v42 }
   0xe   :  { %299 = vmatmul.mubr.msk.bf16.vlgmr.msra.gmra.mrb[0].mxu0 %vm114_vm1, %v263_v31  ;;  %307 = vmatmul.mubr.msk.bf16.vlgmr.msra.gmra.mrb[0].mxu1 %vm114_vm1, %v267_v32 }
   0xf   :  { %302 = vmatprep.mubr.msk.bf16.mxu0 %vm114_vm1, %v264_v34  ;;  %310 = vmatprep.mubr.msk.bf16.mxu1 %vm114_vm1, %v268_v35 }
  0x16   :  { %303 = vmatmul.mubr.msk.bf16.gmra.mrb[4].mxu0 %vm114_vm1, %v265_v43  ;;  %311 = vmatmul.mubr.msk.bf16.gmra.mrb[4].mxu1 %vm114_vm1, %v269_v44 }
  0xe1   :  { %v300_v46 = vpop.f32.mrb[0].mxu0  ;;  %v308_v47 = vpop.f32.mrb[0].mxu1 }
  0xe2   :  { %v186_v48 = vadd.f32 %v300_v46, %v261_v45  ;;  %v218_v49 = vadd.f32 %v308_v47, %v261_v45  ;;  %v177_v50 = vpop.f32.mrb[1].mxu0  ;;  %v209_v51 = vpop.f32.mrb[1].mxu1 }
  0xe3   :  { %v178_v52 = vadd.f32 %v261_v45, %v177_v50  ;;  %v210_v53 = vadd.f32 %v261_v45, %v209_v51  ;;  %v301_v54 = vpop.f32.mrb[2].mxu0  ;;  %v309_v55 = vpop.f32.mrb[2].mxu1 }
  0xe4   :  { %243 = vst.msk [vmem:[%s485_s3 + $0x10] sm:$0xff] %vm240_vm2, %v186_v48  ;;  %251 = vst.msk [vmem:[%s485_s3 + $0x50] sm:$0xff] %vm240_vm2, %v218_v49  ;;  %v189_v56 = vadd.f32 %v301_v54, %v261_v45  ;;  %v221_v57 = vadd.f32 %v309_v55, %v261_v45  ;;  %v180_v58 = vpop.f32.mrb[3].mxu0  ;;  %v212_v59 = vpop.f32.mrb[3].mxu1 }
  0xe5   :  { %241 = vst.msk [vmem:[%s485_s3] sm:$0xff] %vm240_vm2, %v178_v52  ;;  %249 = vst.msk [vmem:[%s485_s3 + $0x40] sm:$0xff] %vm240_vm2, %v210_v53  ;;  %v181_v60 = vadd.f32 %v261_v45, %v180_v58  ;;  %v213_v61 = vadd.f32 %v261_v45, %v212_v59 }
  0xe6   :  { %244 = vst.msk [vmem:[%s485_s3 + $0x18] sm:$0xff] %vm240_vm2, %v189_v56  ;;  %252 = vst.msk [vmem:[%s485_s3 + $0x58] sm:$0xff] %vm240_vm2, %v221_v57 }
  0xe7   :  { %242 = vst.msk [vmem:[%s485_s3 + $0x8] sm:$0xff] %vm240_vm2, %v181_v60  ;;  %250 = vst.msk [vmem:[%s485_s3 + $0x48] sm:$0xff] %vm240_vm2, %v213_v61 }
  0xe9   :  { %v304_v62 = vpop.f32.mrb[4].mxu0  ;;  %v312_v63 = vpop.f32.mrb[4].mxu1 }
  0xea   :  { %v202_v0 = vadd.f32 %v304_v62, %v261_v45  ;;  %v234_v1 = vadd.f32 %v312_v63, %v261_v45  ;;  %v193_v2 = vpop.f32.mrb[5].mxu0  ;;  %v225_v3 = vpop.f32.mrb[5].mxu1 }
  0xeb   :  { %v194_v4 = vadd.f32 %v261_v45, %v193_v2  ;;  %v226_v5 = vadd.f32 %v261_v45, %v225_v3  ;;  %v305_v6 = vpop.f32.mrb[6].mxu0  ;;  %v313_v7 = vpop.f32.mrb[6].mxu1 }
  0xec   :  { %247 = vst.msk [vmem:[%s485_s3 + $0x30] sm:$0xff] %vm240_vm2, %v202_v0  ;;  %255 = vst.msk [vmem:[%s485_s3 + $0x70] sm:$0xff] %vm240_vm2, %v234_v1  ;;  %v205_v8 = vadd.f32 %v305_v6, %v261_v45  ;;  %v237_v9 = vadd.f32 %v313_v7, %v261_v45  ;;  %v196_v10 = vpop.f32.mrb[7].mxu0  ;;  %v228_v11 = vpop.f32.mrb[7].mxu1 }
  0xed   :  { %245 = vst.msk [vmem:[%s485_s3 + $0x20] sm:$0xff] %vm240_vm2, %v194_v4  ;;  %253 = vst.msk [vmem:[%s485_s3 + $0x60] sm:$0xff] %vm240_vm2, %v226_v5  ;;  %v197_v12 = vadd.f32 %v261_v45, %v196_v10  ;;  %v229_v13 = vadd.f32 %v261_v45, %v228_v11 }
  0xee   :  { %248 = vst.msk [vmem:[%s485_s3 + $0x38] sm:$0xff] %vm240_vm2, %v205_v8  ;;  %256 = vst.msk [vmem:[%s485_s3 + $0x78] sm:$0xff] %vm240_vm2, %v237_v9 }
  0xef   :  { %246 = vst.msk [vmem:[%s485_s3 + $0x28] sm:$0xff] %vm240_vm2, %v197_v12  ;;  %254 = vst.msk [vmem:[%s485_s3 + $0x68] sm:$0xff] %vm240_vm2, %v229_v13 }

// kernel: _lambda_.13
= control target key start
LH: loop header
LB: loop body
LE: loop exit
PB: predicated region body
PF: predicated region fallthrough
CT: control target
= control target key end

     0   :  { %v211_v1 = vmov 0.0   ;;  %vm212_vm0 = vmmov 0   ;;  %s266_s0 = inlined_call_operand.vmem [shape: bf16[32,16], index: 0, kind: input, shape index: {}]   ;;  %s267_s1 = inlined_call_operand.vmem [shape: bf16[2,32], index: 1, kind: input, shape index: {}]   ;;  %s268_s2 = inlined_call_operand.vmem [shape: bf16[16,10], index: 2, kind: input, shape index: {}]   ;;  %s269_s3 = inlined_call_operand.vmem [shape: f32[1,10], index: 3, kind: input, shape index: {}]   ;;  %s270_s4 = inlined_call_operand.hbm [shape: f32[2,10], index: 4, kind: output, shape index: {}]  }
   0x1   :  { %v184_v0 = vld [vmem:[%s266_s0] sm:$0xff]   ;;  %167 = vmatprep.subr.bf16.mxu0 %v211_v1  ;;  %175 = vmatprep.subr.bf16.mxu1 %v211_v1  ;;  %v185_v2 = vld [vmem:[%s266_s0 + $0x8] sm:$0xff]  }
   0x2   :  { %168 = vmatpush3.bf16.msra.mxu0 %v184_v0  ;;  %171 = vmatprep.mubr.msk.bf16.mxu0 %vm212_vm0, %v211_v1 }
   0x3   :  { %169 = vmatprep.subr.bf16.mxu0 %v211_v1  ;;  %177 = vmatprep.mubr.msk.bf16.mxu1 %vm212_vm0, %v211_v1 }
   0x4   :  { %9 = vsyncpa [#allocation3], 0  ;;  %v19_v3 = vld [vmem:[%s267_s1] sm:$0x1]  ;;  %vm36_vm1 = vcmask 261120   ;;  %vm96_vm2 = vcmask 130048  }
   0x5   :  { %v186_v4 = vld [vmem:[%s268_s2] sm:$0xff]   ;;  %s213_s24 = smov [#allocation2]   ;;  %vm140_vm3 = vcmask 74752  }
   0x6   :  { %170 = vmatpush3.bf16.msra.mxu0 %v185_v2  ;;  %176 = vmatpush3.bf16.msra.mxu1 %v186_v4  ;;  %v159_v10 = vld [vmem:[%s269_s3] ss:$0 sm:$0xff]  ;;  %s148_s1 = sshll.u32 %s213_s24, 4  ;;  %s149_s1 = int_to_ptr.vmem [resolvable:$true] %s148_s1 }
   0x7   :  { %s187_s2 = scalar_lea.vmem %s149_s1, 32  ;;  %p192_p1 = scmp.lt.s32.totalorder %s149_s1, %s149_s1 }
   0x8   :  { %p188_p0 = scmp.ne.s32.totalorder %s149_s1, %s187_s2  ;;  %p193_p2 = scmp.lt.s32.totalorder %s187_s2, %s187_s2 }
   0x9   :  { %172 = vmatmul.mubr.msk.bf16.vlgmr.msra.gmra.mrb[0].mxu0 %vm36_vm1, %v19_v3 }
   0xa   :  { %p194_p3 = por %p193_p2, %p192_p1 }
   0xc   :  { %p195_p4 = pnand %p194_p3, %p188_p0 }
  0xdc   :  { %v74_v5 = vpop.f32.mrb[0].mxu0 }
  0xdd   :  { %v80_v6 = vpack.c.bf16 %v74_v5, %v74_v5  ;;  %v173_v7 = vpop.f32.mrb[1].mxu0 }
  0xde   :  { %v77_v8 = vpop.f32.mrb[2].mxu0 }
  0xdf   :  { %v174_v9 = vpop.f32.mrb[3].mxu0  ;;  %178 = vmatmul.mubr.msk.bf16.vlgmr.msra.gmra.mrb[0].mxu1 %vm96_vm2, %v80_v6 }
 0x1b2   :  { %v134_v11 = vpop.f32.mrb[0].mxu1 }
 0x1b3   :  { %v135_v12 = vadd.f32 %v159_v10, %v134_v11  ;;  %v179_v13 = vpop.f32.mrb[1].mxu1 }
 0x1b4   :  { %v137_v14 = vpop.f32.mrb[2].mxu1 }
 0x1b5   :  { %v180_v15 = vpop.f32.mrb[3].mxu1  ;;  %141 = vst.msk [vmem:[#allocation2] sm:$0x3] %vm140_vm3, %v135_v12 }
 0x1b6   :  { %198 = shalt.err (!%p195_p4)
}
 0x1b7   :  { %s199_s3 = scalar_lea.hbm %s270_s4, 32 }
 0x1b8   :  { %p200_p5 = scmp.ne.s32.totalorder %s270_s4, %s199_s3  ;;  %p203_p6 = scmp.lt.u32.totalorder %s199_s3, %s270_s4 }
 0x1ba   :  { %p205_p7 = pnand %p203_p6, %p200_p5 }
 0x1bc   :  { %208 = shalt.err (!%p205_p7)
}
 0x1bd   :  { %151 = dma.vmem_to_hbm [thread:$0]  %s149_s1, 32, %s270_s4, [#allocation3]  }
 0x1be   :  { %209 = dma.done.wait [#allocation3], 32  }
 0x1bf   :  { %210 = vsyncadd [#allocation3], 4294967264 }
 0x1c0   :  { %155 = vsyncpa [#allocation3], 1 }

// kernel: _lambda_.10
= control target key start
LH: loop header
LB: loop body
LE: loop exit
PB: predicated region body
PF: predicated region fallthrough
CT: control target
= control target key end

     0   :  { %v1866_v0 = vmov 0   ;;  %vm132_vm0 = vcmask 130048   ;;  %vm223_vm1 = vcmask 261120   ;;  %s2139_s1 = inlined_call_operand.vmem [shape: bf16[144,16], index: 1, kind: input, shape index: {}]   ;;  %s2140_s0 = inlined_call_operand.vmem [shape: bf16[32,144], index: 0, kind: input, shape index: {}]   ;;  %s2141_s5 = inlined_call_operand.vmem [shape: bf16[9,32,32], index: 5, kind: input, shape index: {}]   ;;  %s2142_s3 = inlined_call_operand.vmem [shape: bf16[9,16,16], index: 3, kind: input, shape index: {}]   ;;  %s2143_s2 = inlined_call_operand.vmem [shape: f32[1,16], index: 2, kind: input, shape index: {}, may-alias: {2,4}]   ;;  %s2144_s4 = inlined_call_operand.vmem [shape: f32[1,16], index: 4, kind: input, shape index: {}, may-alias: {2,4}]   ;;  %s2145_s6 = inlined_call_operand.vmem [shape: f32[32,16], index: 6, kind: input, shape index: {}]   ;;  %s2146_s7 = inlined_call_operand.vmem [shape: f32[32,16], index: 7, kind: output, shape index: {}]  }
   0x1   :  { %139 = vmatprep.subr.bf16.mxu0 %v1866_v0  ;;  %v1830_v1 = vld [vmem:[%s2139_s1] sm:$0xff]   ;;  %v1831_v2 = vld [vmem:[%s2139_s1 + $0x8] sm:$0xff]   ;;  %v1832_v3 = vld [vmem:[%s2139_s1 + $0x10] sm:$0xff]  }
   0x2   :  { %140 = vmatpush1.bf16.msra.mxu0 %v1830_v1  ;;  %v27_v4 = vld [vmem:[%s2140_s0] sm:$0xff]  ;;  %v28_v5 = vld [vmem:[%s2140_s0 + $0x8] sm:$0xff]  ;;  %v1833_v6 = vld [vmem:[%s2139_s1 + $0x18] sm:$0xff]  }
   0x3   :  { %141 = vmatprep.subr.bf16.mxu0 %v1866_v0  ;;  %v31_v7 = vmax.bf16 %v1866_v0, %v27_v4  ;;  %v32_v8 = vmax.bf16 %v1866_v0, %v28_v5  ;;  %v1834_v10 = vld [vmem:[%s2139_s1 + $0x20] sm:$0xff]   ;;  %v1835_v11 = vld [vmem:[%s2139_s1 + $0x28] sm:$0xff]   ;;  %v1836_v12 = vld [vmem:[%s2139_s1 + $0x30] sm:$0xff]  }
   0x4   :  { %v1837_v13 = vld [vmem:[%s2139_s1 + $0x38] sm:$0xff]   ;;  %v29_v14 = vld [vmem:[%s2140_s0 + $0x10] sm:$0xff]  ;;  %v1838_v16 = vld [vmem:[%s2139_s1 + $0x40] sm:$0xff]  }
   0x5   :  { %v1478_v9 = vcombine.high %v31_v7, %v32_v8  ;;  %v30_v15 = vld [vmem:[%s2140_s0 + $0x18] sm:$0xff]  ;;  %v33_v17 = vmax.bf16 %v1866_v0, %v29_v14  ;;  %v1477_v19 = vcombine.low %v31_v7, %v32_v8  ;;  %v1839_v22 = vld [vmem:[%s2141_s5] sm:$0xff]   ;;  %v1842_v23 = vld [vmem:[%s2141_s5 + $0x30] sm:$0xff]  }
   0x6   :  { %142 = vmatpush1.bf16.msra.mxu0 %v1831_v2  ;;  %v34_v18 = vmax.bf16 %v1866_v0, %v30_v15  ;;  %1671 = vmatprep.mubr.msk.bf16.mxu1 %vm223_vm1, %v1839_v22  ;;  %v1476_v24 = vld [vmem:[%s2143_s2] ss:$0 sm:$0xff]  ;;  %v1840_v44 = vld [vmem:[%s2141_s5 + $0x8] sm:$0xff]   ;;  %v1843_v45 = vld [vmem:[%s2141_s5 + $0x38] sm:$0xff]  }
   0x7   :  { %143 = vmatprep.subr.bf16.mxu0 %v1866_v0  ;;  %1490 = vmatprep.mubr.msk.bf16.mxu0 %vm132_vm0, %v1478_v9  ;;  %v1841_v43 = vld [vmem:[%s2142_s3] sm:$0xff]   ;;  %v1845_v47 = vld [vmem:[%s2141_s5 + $0x48] sm:$0xff]   ;;  %v1846_v48 = vld [vmem:[%s2141_s5 + $0x50] sm:$0xff]  }
   0x8   :  { %v1480_v20 = vcombine.high %v33_v17, %v34_v18  ;;  %v1479_v21 = vcombine.low %v33_v17, %v34_v18  ;;  %v1844_v46 = vld [vmem:[%s2141_s5 + $0x40] sm:$0xff]   ;;  %v1847_v49 = vld [vmem:[%s2141_s5 + $0x58] sm:$0xff]   ;;  %v1849_v51 = vld [vmem:[%s2141_s5 + $0x68] sm:$0xff]  }
   0x9   :  { %v1848_v50 = vld [vmem:[%s2141_s5 + $0x60] sm:$0xff]   ;;  %v1850_v52 = vld [vmem:[%s2141_s5 + $0x70] sm:$0xff]   ;;  %v1851_v53 = vld [vmem:[%s2141_s5 + $0x78] sm:$0xff]  }
   0xa   :  { %144 = vmatpush1.bf16.msra.mxu0 %v1832_v3  ;;  %v1852_v60 = vld [vmem:[%s2141_s5 + $0x10] sm:$0xff]   ;;  %v1853_v61 = vld [vmem:[%s2142_s3 + $0x8] sm:$0xff]   ;;  %v1854_v62 = vld [vmem:[%s2141_s5 + $0x18] sm:$0xff]  }
   0xb   :  { %145 = vmatprep.subr.bf16.mxu0 %v1866_v0  ;;  %v1857_v63 = vld [vmem:[%s2141_s5 + $0x80] sm:$0xff]   ;;  %v1859_v8 = vld [vmem:[%s2142_s3 + $0x10] sm:$0xff]   ;;  %v1856_v9 = vld [vmem:[%s2141_s5 + $0x28] sm:$0xff]  }
   0xc   :  { %v1855_v7 = vld [vmem:[%s2141_s5 + $0x20] sm:$0xff]  }
   0xe   :  { %146 = vmatpush1.bf16.msra.mxu0 %v1833_v6 }
   0xf   :  { %147 = vmatprep.subr.bf16.mxu0 %v1866_v0 }
  0x12   :  { %148 = vmatpush1.bf16.msra.mxu0 %v1834_v10  ;;  %v1860_v10 = vld [vmem:[%s2142_s3 + $0x18] sm:$0xff]  }
  0x13   :  { %149 = vmatprep.subr.bf16.mxu0 %v1866_v0 }
  0x16   :  { %150 = vmatpush1.bf16.msra.mxu0 %v1835_v11 }
  0x17   :  { %151 = vmatprep.subr.bf16.mxu0 %v1866_v0 }
  0x1a   :  { %152 = vmatpush1.bf16.msra.mxu0 %v1836_v12 }
  0x1b   :  { %153 = vmatprep.subr.bf16.mxu0 %v1866_v0 }
  0x1e   :  { %154 = vmatpush1.bf16.msra.mxu0 %v1837_v13 }
  0x1f   :  { %155 = vmatprep.subr.bf16.mxu0 %v1866_v0  ;;  %v1858_v0 = vld [vmem:[%s2141_s5 + $0x88] sm:$0xff]  }
  0x22   :  { %156 = vmatpush1.bf16.msra.mxu0 %v1838_v16 }
  0x25   :  { %172 = vmatmul.mubr.bf16.vlgmr.msra.gmra.mrb[0].mxu0 %v1477_v19 }
  0x26   :  { %1491 = vmatprep.mubr.msk.bf16.mxu0 %vm132_vm0, %v1480_v20 }
  0x2d   :  { %180 = vmatmul.mubr.bf16.gmra.mrb[4].mxu0 %v1479_v21 }
  0x2e   :  { %1713 = vmatprep.mubr.msk.bf16.mxu0 %vm223_vm1, %v1842_v23 }
  0xf8   :  { %v173_v25 = vpop.f32.mrb[0].mxu0 }
  0xf9   :  { %v174_v26 = vadd.f32 %v1476_v24, %v173_v25  ;;  %v175_v27 = vpop.f32.mrb[1].mxu0 }
  0xfa   :  { %v176_v28 = vpop.f32.mrb[2].mxu0 }
  0xfb   :  { %v177_v29 = vadd.f32 %v1476_v24, %v176_v28  ;;  %v178_v30 = vpop.f32.mrb[3].mxu0  ;;  %v188_v31 = vmax.f32 %v174_v26, 0.0 }
  0xfd   :  { %v189_v32 = vmax.f32 %v177_v29, 0.0 }
  0xff   :  { %v1959_v33 = vpack.c.bf16 %v189_v32, %v188_v31 }
 0x100   :  { %v181_v34 = vpop.f32.mrb[4].mxu0 }
 0x101   :  { %v182_v35 = vadd.f32 %v1476_v24, %v181_v34  ;;  %v183_v36 = vpop.f32.mrb[5].mxu0  ;;  %1667 = vmatprep.subr.bf16.mxu1 %v1959_v33  ;;  %1709 = vmatprep.subr.bf16.mxu0 %v1959_v33 }
 0x102   :  { %v184_v37 = vpop.f32.mrb[6].mxu0  ;;  %1668 = vmatpush3.bf16.msra.mxu1 %v1959_v33  ;;  %1710 = vmatpush3.bf16.msra.mxu0 %v1959_v33 }
 0x103   :  { %v185_v38 = vadd.f32 %v1476_v24, %v184_v37  ;;  %v186_v39 = vpop.f32.mrb[7].mxu0  ;;  %v190_v40 = vmax.f32 %v182_v35, 0.0 }
 0x105   :  { %v191_v41 = vmax.f32 %v185_v38, 0.0 }
 0x107   :  { %v1965_v42 = vpack.c.bf16 %v191_v41, %v190_v40 }
 0x109   :  { %1669 = vmatprep.subr.bf16.mxu1 %v1965_v42  ;;  %1711 = vmatprep.subr.bf16.mxu0 %v1965_v42 }
 0x10a   :  { %1670 = vmatpush3.bf16.msra.mxu1 %v1965_v42  ;;  %1712 = vmatpush3.bf16.msra.mxu0 %v1965_v42 }
 0x10b   :  { %1723 = vmatprep.subr.bf16.mxu0 %v1959_v33  ;;  %1675 = vmatprep.subr.bf16.mxu1 %v1841_v43 }
 0x10d   :  { %1672 = vmatmul.mubr.msk.bf16.vlgmr.msra.gmra.mrb[0].mxu1 %vm223_vm1, %v1840_v44  ;;  %1714 = vmatmul.mubr.msk.bf16.vlgmr.msra.gmra.mrb[8].mxu0 %vm223_vm1, %v1843_v45 }
 0x10e   :  { %1676 = vmatpush3.bf16.msra.mxu1 %v1841_v43  ;;  %1724 = vmatpush3.bf16.msra.mxu0 %v1959_v33 }
 0x10f   :  { %1681 = vmatprep.subr.bf16.mxu1 %v1959_v33  ;;  %1725 = vmatprep.subr.bf16.mxu0 %v1965_v42 }
 0x110   :  { %1727 = vmatprep.mubr.msk.bf16.mxu0 %vm223_vm1, %v1844_v46 }
 0x112   :  { %1726 = vmatpush3.bf16.msra.mxu0 %v1965_v42 }
 0x113   :  { %1737 = vmatprep.subr.bf16.mxu0 %v1959_v33 }
 0x115   :  { %1728 = vmatmul.mubr.msk.bf16.vlgmr.msra.gmra.mrb[12].mxu0 %vm223_vm1, %v1845_v47 }
 0x116   :  { %1738 = vmatpush3.bf16.msra.mxu0 %v1959_v33  ;;  %1741 = vmatprep.mubr.msk.bf16.mxu0 %vm223_vm1, %v1846_v48 }
 0x117   :  { %1739 = vmatprep.subr.bf16.mxu0 %v1965_v42 }
 0x11a   :  { %1740 = vmatpush3.bf16.msra.mxu0 %v1965_v42 }
 0x11b   :  { %1751 = vmatprep.subr.bf16.mxu0 %v1959_v33 }
 0x11d   :  { %1742 = vmatmul.mubr.msk.bf16.vlgmr.msra.gmra.mrb[16].mxu0 %vm223_vm1, %v1847_v49 }
 0x11e   :  { %1752 = vmatpush3.bf16.msra.mxu0 %v1959_v33  ;;  %1755 = vmatprep.mubr.msk.bf16.mxu0 %vm223_vm1, %v1848_v50 }
 0x11f   :  { %1753 = vmatprep.subr.bf16.mxu0 %v1965_v42 }
 0x122   :  { %1754 = vmatpush3.bf16.msra.mxu0 %v1965_v42 }
 0x123   :  { %1765 = vmatprep.subr.bf16.mxu0 %v1959_v33 }
 0x125   :  { %1756 = vmatmul.mubr.msk.bf16.vlgmr.msra.gmra.mrb[20].mxu0 %vm223_vm1, %v1849_v51 }
 0x126   :  { %1766 = vmatpush3.bf16.msra.mxu0 %v1959_v33  ;;  %1769 = vmatprep.mubr.msk.bf16.mxu0 %vm223_vm1, %v1850_v52 }
 0x127   :  { %1767 = vmatprep.subr.bf16.mxu0 %v1965_v42 }
 0x12a   :  { %1768 = vmatpush3.bf16.msra.mxu0 %v1965_v42 }
 0x12b   :  { %1779 = vmatprep.subr.bf16.mxu0 %v1959_v33 }
 0x12d   :  { %1770 = vmatmul.mubr.msk.bf16.vlgmr.msra.gmra.mrb[24].mxu0 %vm223_vm1, %v1851_v53  ;;  %v1861_v53 = vld [vmem:[%s2142_s3 + $0x20] sm:$0xff]  }
 0x12e   :  { %1780 = vmatpush3.bf16.msra.mxu0 %v1959_v33  ;;  %1783 = vmatprep.mubr.msk.bf16.mxu0 %vm223_vm1, %v1857_v63  ;;  %v195_v63 = vld [vmem:[%s2145_s6 + $0x8] sm:$0xff] }
 0x12f   :  { %1781 = vmatprep.subr.bf16.mxu0 %v1965_v42 }
 0x132   :  { %1782 = vmatpush3.bf16.msra.mxu0 %v1965_v42 }
 0x135   :  { %1784 = vmatmul.mubr.msk.bf16.vlgmr.msra.gmra.mrb[28].mxu0 %vm223_vm1, %v1858_v0 }
 0x1e0   :  { %v1673_v54 = vpop.f32.mrb[0].mxu1  ;;  %v1715_v11 = vpop.f32.mrb[8].mxu0 }
 0x1e1   :  { %v264_v55 = vpop.f32.mrb[1].mxu1  ;;  %v683_v12 = vpop.f32.mrb[9].mxu0 }
 0x1e2   :  { %v1674_v56 = vpop.f32.mrb[2].mxu1  ;;  %v1716_v13 = vpop.f32.mrb[10].mxu0 }
 0x1e3   :  { %v280_v57 = vpack.c.bf16 %v1674_v56, %v1673_v54  ;;  %v267_v58 = vpop.f32.mrb[3].mxu1  ;;  %v699_v14 = vpack.c.bf16 %v1716_v13, %v1715_v11  ;;  %v686_v15 = vpop.f32.mrb[11].mxu0  ;;  %v1862_v54 = vld [vmem:[%s2142_s3 + $0x28] sm:$0xff]   ;;  %v1864_v56 = vld [vmem:[%s2142_s3 + $0x38] sm:$0xff]  }
 0x1e4   :  { %v279_v59 = vpack.c.bf16 %v267_v58, %v264_v55  ;;  %v698_v16 = vpack.c.bf16 %v686_v15, %v683_v12  ;;  %v1863_v55 = vld [vmem:[%s2142_s3 + $0x30] sm:$0xff]  }
 0x1e5   :  { %v196_v58 = vld [vmem:[%s2145_s6 + $0x10] sm:$0xff] }
 0x1e6   :  { %1677 = vmatprep.mubr.msk.bf16.mxu1 %vm132_vm0, %v279_v59  ;;  %v1492_v59 = vld [vmem:[%s2144_s4] ss:$0 sm:$0xff] }
 0x1e7   :  { %1678 = vmatmul.mubr.msk.bf16.vlgmr.msra.gmra.mrb[4].mxu1 %vm132_vm0, %v280_v57  ;;  %v1865_v57 = vld [vmem:[%s2142_s3 + $0x40] sm:$0xff]  }
 0x1e8   :  { %1682 = vmatpush3.bf16.msra.mxu1 %v1959_v33  ;;  %1685 = vmatprep.mubr.msk.bf16.mxu1 %vm223_vm1, %v1852_v60  ;;  %v1729_v17 = vpop.f32.mrb[12].mxu0  ;;  %v194_v60 = vld [vmem:[%s2145_s6] sm:$0xff] }
 0x1e9   :  { %1683 = vmatprep.subr.bf16.mxu1 %v1965_v42  ;;  %v823_v18 = vpop.f32.mrb[13].mxu0  ;;  %v205_v0 = vadd.f32 %v1492_v59, %v194_v60 }
 0x1ea   :  { %v1730_v19 = vpop.f32.mrb[14].mxu0 }
 0x1eb   :  { %v839_v20 = vpack.c.bf16 %v1730_v19, %v1729_v17  ;;  %v826_v21 = vpop.f32.mrb[15].mxu0 }
 0x1ec   :  { %1684 = vmatpush3.bf16.msra.mxu1 %v1965_v42  ;;  %v838_v22 = vpack.c.bf16 %v826_v21, %v823_v18 }
 0x1ed   :  { %1689 = vmatprep.subr.bf16.mxu1 %v1853_v61 }
 0x1ef   :  { %1686 = vmatmul.mubr.msk.bf16.vlgmr.msra.gmra.mrb[8].mxu1 %vm223_vm1, %v1854_v62  ;;  %v207_v62 = vadd.f32 %v1492_v59, %v196_v58 }
 0x1f0   :  { %1690 = vmatpush3.bf16.msra.mxu1 %v1853_v61  ;;  %v1743_v23 = vpop.f32.mrb[16].mxu0  ;;  %v197_v61 = vld [vmem:[%s2145_s6 + $0x18] sm:$0xff] }
 0x1f1   :  { %1695 = vmatprep.subr.bf16.mxu1 %v1959_v33  ;;  %v963_v24 = vpop.f32.mrb[17].mxu0 }
 0x1f2   :  { %v1744_v25 = vpop.f32.mrb[18].mxu0 }
 0x1f3   :  { %v979_v26 = vpack.c.bf16 %v1744_v25, %v1743_v23  ;;  %v966_v27 = vpop.f32.mrb[19].mxu0 }
 0x1f4   :  { %v978_v28 = vpack.c.bf16 %v966_v27, %v963_v24 }
 0x1f8   :  { %v1757_v29 = vpop.f32.mrb[20].mxu0 }
 0x1f9   :  { %v1103_v30 = vpop.f32.mrb[21].mxu0 }
 0x1fa   :  { %v1758_v31 = vpop.f32.mrb[22].mxu0 }
 0x1fb   :  { %v1119_v32 = vpack.c.bf16 %v1758_v31, %v1757_v29 }
 0x2c2   :  { %v1687_v1 = vpop.f32.mrb[8].mxu1 }
 0x2c3   :  { %v403_v2 = vpop.f32.mrb[9].mxu1 }
 0x2c4   :  { %v1688_v3 = vpop.f32.mrb[10].mxu1 }
 0x2c5   :  { %v419_v4 = vpack.c.bf16 %v1688_v3, %v1687_v1  ;;  %v406_v5 = vpop.f32.mrb[11].mxu1  ;;  %v208_v1 = vadd.f32 %v1492_v59, %v197_v61  ;;  %v206_v3 = vadd.f32 %v1492_v59, %v195_v63 }
 0x2c6   :  { %v418_v6 = vpack.c.bf16 %v406_v5, %v403_v2 }
 0x2c8   :  { %1691 = vmatprep.mubr.msk.bf16.mxu1 %vm132_vm0, %v418_v6 }
 0x2c9   :  { %1692 = vmatmul.mubr.msk.bf16.vlgmr.msra.gmra.mrb[4].mxu1 %vm132_vm0, %v419_v4 }
 0x2ca   :  { %1696 = vmatpush3.bf16.msra.mxu1 %v1959_v33  ;;  %1699 = vmatprep.mubr.msk.bf16.mxu1 %vm223_vm1, %v1855_v7  ;;  %v1106_v33 = vpop.f32.mrb[23].mxu0 }
 0x2cb   :  { %1697 = vmatprep.subr.bf16.mxu1 %v1965_v42  ;;  %v1118_v34 = vpack.c.bf16 %v1106_v33, %v1103_v30  ;;  %v1771_v35 = vpop.f32.mrb[24].mxu0 }
 0x2cc   :  { %v1243_v36 = vpop.f32.mrb[25].mxu0 }
 0x2cd   :  { %v1772_v37 = vpop.f32.mrb[26].mxu0 }
 0x2ce   :  { %1698 = vmatpush3.bf16.msra.mxu1 %v1965_v42  ;;  %v1259_v38 = vpack.c.bf16 %v1772_v37, %v1771_v35  ;;  %v1246_v39 = vpop.f32.mrb[27].mxu0 }
 0x2cf   :  { %1703 = vmatprep.subr.bf16.mxu1 %v1859_v8  ;;  %v1258_v40 = vpack.c.bf16 %v1246_v39, %v1243_v36  ;;  %v1785_v41 = vpop.f32.mrb[28].mxu0 }
 0x2d0   :  { %v1383_v42 = vpop.f32.mrb[29].mxu0 }
 0x2d1   :  { %1700 = vmatmul.mubr.msk.bf16.vlgmr.msra.gmra.mrb[12].mxu1 %vm223_vm1, %v1856_v9  ;;  %v1786_v43 = vpop.f32.mrb[30].mxu0 }
 0x2d2   :  { %1704 = vmatpush3.bf16.msra.mxu1 %v1859_v8  ;;  %v1399_v44 = vpack.c.bf16 %v1786_v43, %v1785_v41  ;;  %v1386_v45 = vpop.f32.mrb[31].mxu0 }
 0x2d3   :  { %1717 = vmatprep.subr.bf16.mxu1 %v1860_v10  ;;  %v1398_v46 = vpack.c.bf16 %v1386_v45, %v1383_v42 }
 0x3a4   :  { %v1701_v47 = vpop.f32.mrb[12].mxu1 }
 0x3a5   :  { %v543_v48 = vpop.f32.mrb[13].mxu1 }
 0x3a6   :  { %v1702_v49 = vpop.f32.mrb[14].mxu1 }
 0x3a7   :  { %v559_v50 = vpack.c.bf16 %v1702_v49, %v1701_v47  ;;  %v546_v51 = vpop.f32.mrb[15].mxu1 }
 0x3a8   :  { %v558_v52 = vpack.c.bf16 %v546_v51, %v543_v48 }
 0x3aa   :  { %1705 = vmatprep.mubr.msk.bf16.mxu1 %vm132_vm0, %v558_v52 }
 0x3ab   :  { %1706 = vmatmul.mubr.msk.bf16.vlgmr.msra.gmra.mrb[4].mxu1 %vm132_vm0, %v559_v50 }
 0x3ac   :  { %1718 = vmatpush3.bf16.msra.mxu1 %v1860_v10  ;;  %1719 = vmatprep.mubr.msk.bf16.mxu1 %vm132_vm0, %v698_v16 }
 0x3ad   :  { %1731 = vmatprep.subr.bf16.mxu1 %v1861_v53 }
 0x3b7   :  { %1720 = vmatmul.mubr.msk.bf16.vlgmr.msra.gmra.mrb[4].mxu1 %vm132_vm0, %v699_v14 }
 0x3b8   :  { %1732 = vmatpush3.bf16.msra.mxu1 %v1861_v53  ;;  %1733 = vmatprep.mubr.msk.bf16.mxu1 %vm132_vm0, %v838_v22 }
 0x3b9   :  { %1745 = vmatprep.subr.bf16.mxu1 %v1862_v54 }
 0x3c3   :  { %1734 = vmatmul.mubr.msk.bf16.vlgmr.msra.gmra.mrb[4].mxu1 %vm132_vm0, %v839_v20 }
 0x3c4   :  { %1746 = vmatpush3.bf16.msra.mxu1 %v1862_v54  ;;  %1747 = vmatprep.mubr.msk.bf16.mxu1 %vm132_vm0, %v978_v28 }
 0x3c5   :  { %1759 = vmatprep.subr.bf16.mxu1 %v1863_v55 }
 0x3cf   :  { %1748 = vmatmul.mubr.msk.bf16.vlgmr.msra.gmra.mrb[4].mxu1 %vm132_vm0, %v979_v26 }
 0x3d0   :  { %1760 = vmatpush3.bf16.msra.mxu1 %v1863_v55  ;;  %1761 = vmatprep.mubr.msk.bf16.mxu1 %vm132_vm0, %v1118_v34 }
 0x3d1   :  { %1773 = vmatprep.subr.bf16.mxu1 %v1864_v56 }
 0x3db   :  { %1762 = vmatmul.mubr.msk.bf16.vlgmr.msra.gmra.mrb[4].mxu1 %vm132_vm0, %v1119_v32 }
 0x3dc   :  { %1774 = vmatpush3.bf16.msra.mxu1 %v1864_v56  ;;  %1775 = vmatprep.mubr.msk.bf16.mxu1 %vm132_vm0, %v1258_v40 }
 0x3dd   :  { %1787 = vmatprep.subr.bf16.mxu1 %v1865_v57 }
 0x3e7   :  { %1776 = vmatmul.mubr.msk.bf16.vlgmr.msra.gmra.mrb[4].mxu1 %vm132_vm0, %v1259_v38 }
 0x3e8   :  { %1788 = vmatpush3.bf16.msra.mxu1 %v1865_v57  ;;  %1789 = vmatprep.mubr.msk.bf16.mxu1 %vm132_vm0, %v1398_v46 }
 0x3f3   :  { %1790 = vmatmul.mubr.msk.bf16.vlgmr.msra.gmra.mrb[4].mxu1 %vm132_vm0, %v1399_v44 }
 0x4c6   :  { %v1791_v2 = vpop.f32.mrb[4].mxu1 }
 0x4c7   :  { %v1793_v4 = vadd.f32 %v1791_v2, %v207_v62  ;;  %v1449_v5 = vpop.f32.mrb[5].mxu1 }
 0x4c8   :  { %v1794_v6 = vadd.f32 %v1449_v5, %v205_v0  ;;  %v1792_v7 = vpop.f32.mrb[6].mxu1 }
 0x4c9   :  { %1470 = vst.msk [vmem:[%s2146_s7 + $0x10] sm:$0xff] %vm132_vm0, %v1793_v4  ;;  %v1795_v8 = vadd.f32 %v1792_v7, %v208_v1  ;;  %v1452_v9 = vpop.f32.mrb[7].mxu1 }
 0x4ca   :  { %1468 = vst.msk [vmem:[%s2146_s7] sm:$0xff] %vm132_vm0, %v1794_v6  ;;  %v1796_v10 = vadd.f32 %v1452_v9, %v206_v3 }
 0x4cb   :  { %1471 = vst.msk [vmem:[%s2146_s7 + $0x18] sm:$0xff] %vm132_vm0, %v1795_v8 }
 0x4cc   :  { %1469 = vst.msk [vmem:[%s2146_s7 + $0x8] sm:$0xff] %vm132_vm0, %v1796_v10 }

// kernel: _lambda_.9
= control target key start
LH: loop header
LB: loop body
LE: loop exit
PB: predicated region body
PF: predicated region fallthrough
CT: control target
= control target key end

     0   :  { %v1977_v5 = vmov 0   ;;  %vm88_vm0 = vcmask 588800   ;;  %vm95_vm1 = vcmask 1043456   ;;  %vm279_vm2 = vcmask 261120   ;;  %s2247_s1 = inlined_call_operand.vmem [shape: bf16[72,16], index: 1, kind: input, shape index: {}]   ;;  %s2248_s0 = inlined_call_operand.vmem [shape: bf16[32,72], index: 0, kind: input, shape index: {}]   ;;  %s2249_s5 = inlined_call_operand.vmem [shape: bf16[9,32,32], index: 5, kind: input, shape index: {}]   ;;  %s2250_s6 = inlined_call_operand.vmem [shape: bf16[72,16], index: 6, kind: input, shape index: {}]   ;;  %s2251_s3 = inlined_call_operand.vmem [shape: bf16[9,16,16], index: 3, kind: input, shape index: {}]   ;;  %s2252_s2 = inlined_call_operand.vmem [shape: f32[1,16], index: 2, kind: input, shape index: {}, may-alias: {2,4}]   ;;  %s2253_s4 = inlined_call_operand.vmem [shape: f32[1,16], index: 4, kind: input, shape index: {}, may-alias: {2,4}]   ;;  %s2254_s7 = inlined_call_operand.vmem [shape: f32[32,16], index: 7, kind: output, shape index: {}]  }
   0x1   :  { %v1938_v0 = vld [vmem:[%s2247_s1] sm:$0xff]   ;;  %v1939_v1 = vld [vmem:[%s2247_s1 + $0x8] sm:$0xff]   ;;  %v1940_v2 = vld [vmem:[%s2247_s1 + $0x10] sm:$0xff]   ;;  %vm345_vm3 = vcmask 130048  }
   0x2   :  { %1741 = vmatprep.subr.bf16.mxu0 %v1938_v0  ;;  %v27_v3 = vld [vmem:[%s2248_s0] sm:$0xf]  ;;  %v28_v4 = vld [vmem:[%s2248_s0 + $0x4] sm:$0xf]  ;;  %v1941_v8 = vld [vmem:[%s2247_s1 + $0x18] sm:$0xff]  }
   0x3   :  { %1742 = vmatpush3.bf16.msra.mxu0 %v1938_v0  ;;  %v31_v6 = vmax.bf16 %v1977_v5, %v27_v3  ;;  %v32_v7 = vmax.bf16 %v1977_v5, %v28_v4  ;;  %v29_v10 = vld [vmem:[%s2248_s0 + $0x8] sm:$0xf]  ;;  %v30_v11 = vld [vmem:[%s2248_s0 + $0xc] sm:$0xf]  ;;  %v1942_v12 = vld [vmem:[%s2247_s1 + $0x20] ss:$0 sps:$4 sm:$0xff]   ;;  %v1544_v18 = vcombine.low %v27_v3, %v28_v4 }
   0x4   :  { %1743 = vmatprep.subr.bf16.mxu0 %v1939_v1  ;;  %v33_v13 = vmax.bf16 %v1977_v5, %v29_v10  ;;  %v34_v14 = vmax.bf16 %v1977_v5, %v30_v11  ;;  %v97_v15 = vsel %vm95_vm1, %v1942_v12, 0  ;;  %v1943_v17 = vld [vmem:[%s2249_s5] sm:$0xff]   ;;  %v1962_v20 = vld [vmem:[%s2250_s6 + $0x8] sm:$0xff]   ;;  %v1963_v21 = vld [vmem:[%s2250_s6 + $0x10] sm:$0xff]   ;;  %v1545_v26 = vcombine.low %v29_v10, %v30_v11 }
   0x5   :  { %v1534_v9 = vcombine.low %v31_v6, %v32_v7  ;;  %v1961_v19 = vld [vmem:[%s2250_s6] sm:$0xff]   ;;  %1765 = vmatprep.mubr.msk.bf16.mxu1 %vm88_vm0, %v1544_v18  ;;  %v1964_v22 = vld [vmem:[%s2250_s6 + $0x18] sm:$0xff]   ;;  %v1944_v42 = vld [vmem:[%s2249_s5 + $0x8] sm:$0xff]  }
   0x6   :  { %v1535_v16 = vcombine.low %v33_v13, %v34_v14  ;;  %1755 = vmatprep.subr.bf16.mxu1 %v1961_v19  ;;  %v1965_v23 = vld [vmem:[%s2250_s6 + $0x20] ss:$0 sps:$4 sm:$0xff]   ;;  %v1945_v43 = vld [vmem:[%s2249_s5 + $0x10] sm:$0xff]   ;;  %v1946_v44 = vld [vmem:[%s2249_s5 + $0x18] sm:$0xff]  }
   0x7   :  { %1744 = vmatpush3.bf16.msra.mxu0 %v1939_v1  ;;  %1751 = vmatprep.mubr.msk.bf16.mxu0 %vm88_vm0, %v1534_v9  ;;  %v214_v24 = vsel %vm95_vm1, %v1965_v23, 0  ;;  %v1968_v25 = vld [vmem:[%s2251_s3] sm:$0xff]   ;;  %v1948_v46 = vld [vmem:[%s2249_s5 + $0x28] sm:$0xff]   ;;  %v1949_v47 = vld [vmem:[%s2249_s5 + $0x30] sm:$0xff]  }
   0x8   :  { %1745 = vmatprep.subr.bf16.mxu0 %v1940_v2  ;;  %1756 = vmatpush3.bf16.msra.mxu1 %v1961_v19  ;;  %v1533_v27 = vld [vmem:[%s2252_s2] ss:$0 sm:$0xff]  ;;  %v1950_v48 = vld [vmem:[%s2249_s5 + $0x38] sm:$0xff]   ;;  %v1952_v50 = vld [vmem:[%s2249_s5 + $0x48] sm:$0xff]  }
   0x9   :  { %1757 = vmatprep.subr.bf16.mxu1 %v1962_v20  ;;  %v1947_v45 = vld [vmem:[%s2249_s5 + $0x20] sm:$0xff]   ;;  %v1953_v51 = vld [vmem:[%s2249_s5 + $0x50] sm:$0xff]   ;;  %v1954_v52 = vld [vmem:[%s2249_s5 + $0x58] sm:$0xff]  }
   0xa   :  { %v1951_v49 = vld [vmem:[%s2249_s5 + $0x40] sm:$0xff]   ;;  %v1956_v54 = vld [vmem:[%s2249_s5 + $0x68] sm:$0xff]   ;;  %v1957_v55 = vld [vmem:[%s2249_s5 + $0x70] sm:$0xff]  }
   0xb   :  { %1746 = vmatpush3.bf16.msra.mxu0 %v1940_v2  ;;  %v1955_v53 = vld [vmem:[%s2249_s5 + $0x60] sm:$0xff]   ;;  %v1958_v56 = vld [vmem:[%s2249_s5 + $0x78] sm:$0xff]   ;;  %v1960_v58 = vld [vmem:[%s2249_s5 + $0x88] sm:$0xff]  }
   0xc   :  { %1747 = vmatprep.subr.bf16.mxu0 %v1941_v8  ;;  %1758 = vmatpush3.bf16.msra.mxu1 %v1962_v20  ;;  %v1959_v57 = vld [vmem:[%s2249_s5 + $0x80] sm:$0xff]   ;;  %v1969_v59 = vld [vmem:[%s2251_s3 + $0x8] sm:$0xff]   ;;  %v1970_v2 = vld [vmem:[%s2251_s3 + $0x10] sm:$0xff]  }
   0xd   :  { %1759 = vmatprep.subr.bf16.mxu1 %v1963_v21  ;;  %v1971_v11 = vld [vmem:[%s2251_s3 + $0x18] sm:$0xff]  }
   0xf   :  { %1748 = vmatpush3.bf16.msra.mxu0 %v1941_v8 }
  0x10   :  { %1935 = vmatprep.subr.msk.bf16.mxu0 %vm95_vm1, %v1942_v12  ;;  %1760 = vmatpush3.bf16.msra.mxu1 %v1963_v21 }
  0x11   :  { %1761 = vmatprep.subr.bf16.mxu1 %v1964_v22 }
  0x13   :  { %1750 = vmatpush3.bf16.msra.mxu0 %v97_v15 }
  0x14   :  { %1762 = vmatpush3.bf16.msra.mxu1 %v1964_v22  ;;  %v1972_v22 = vld [vmem:[%s2251_s3 + $0x20] sm:$0xff]  }
  0x15   :  { %1936 = vmatprep.subr.msk.bf16.mxu1 %vm95_vm1, %v1965_v23 }
  0x16   :  { %1752 = vmatmul.mubr.msk.bf16.vlgmr.msra.gmra.mrb[0].mxu0 %vm88_vm0, %v1535_v16 }
  0x17   :  { %1773 = vmatprep.mubr.msk.bf16.mxu0 %vm279_vm2, %v1943_v17 }
  0x18   :  { %1764 = vmatpush3.bf16.msra.mxu1 %v214_v24 }
  0x19   :  { %1777 = vmatprep.subr.bf16.mxu1 %v1968_v25 }
  0x1b   :  { %1766 = vmatmul.mubr.msk.bf16.vlgmr.msra.gmra.mrb[0].mxu1 %vm88_vm0, %v1545_v26 }
  0x1c   :  { %1778 = vmatpush3.bf16.msra.mxu1 %v1968_v25 }
  0x1d   :  { %1791 = vmatprep.subr.bf16.mxu1 %v1969_v59 }
  0xe9   :  { %v1753_v28 = vpop.f32.mrb[0].mxu0 }
  0xea   :  { %v142_v29 = vadd.f32 %v1753_v28, %v1533_v27  ;;  %v133_v30 = vpop.f32.mrb[1].mxu0 }
  0xeb   :  { %v134_v31 = vadd.f32 %v1533_v27, %v133_v30  ;;  %v1754_v32 = vpop.f32.mrb[2].mxu0  ;;  %v1973_v30 = vld [vmem:[%s2251_s3 + $0x28] sm:$0xff]  }
  0xec   :  { %v145_v33 = vadd.f32 %v1754_v32, %v1533_v27  ;;  %v136_v34 = vpop.f32.mrb[3].mxu0  ;;  %v150_v36 = vmax.f32 %v142_v29, 0.0 }
  0xed   :  { %v137_v35 = vadd.f32 %v1533_v27, %v136_v34  ;;  %v148_v38 = vmax.f32 %v134_v31, 0.0 }
  0xee   :  { %v151_v37 = vmax.f32 %v145_v33, 0.0 }
  0xef   :  { %v149_v39 = vmax.f32 %v137_v35, 0.0 }
  0xf0   :  { %v2078_v40 = vpack.c.bf16 %v151_v37, %v150_v36 }
  0xf1   :  { %v2080_v41 = vpack.c.bf16 %v149_v39, %v148_v38 }
  0xf3   :  { %1769 = vmatprep.subr.bf16.mxu0 %v2080_v41 }
  0xf4   :  { %1770 = vmatpush3.bf16.msra.mxu0 %v2080_v41 }
  0xf5   :  { %1771 = vmatprep.subr.bf16.mxu0 %v2078_v40 }
  0xf8   :  { %1772 = vmatpush3.bf16.msra.mxu0 %v2078_v40 }
  0xf9   :  { %1783 = vmatprep.subr.bf16.mxu0 %v2080_v41 }
  0xfb   :  { %1774 = vmatmul.mubr.msk.bf16.vlgmr.msra.gmra.mrb[4].mxu0 %vm279_vm2, %v1944_v42  ;;  %v1974_v42 = vld [vmem:[%s2251_s3 + $0x30] sm:$0xff]  }
  0xfc   :  { %1784 = vmatpush3.bf16.msra.mxu0 %v2080_v41  ;;  %1787 = vmatprep.mubr.msk.bf16.mxu0 %vm279_vm2, %v1945_v43 }
  0xfd   :  { %1785 = vmatprep.subr.bf16.mxu0 %v2078_v40 }
 0x100   :  { %1786 = vmatpush3.bf16.msra.mxu0 %v2078_v40 }
 0x101   :  { %1797 = vmatprep.subr.bf16.mxu0 %v2080_v41 }
 0x103   :  { %1788 = vmatmul.mubr.msk.bf16.vlgmr.msra.gmra.mrb[8].mxu0 %vm279_vm2, %v1946_v44 }
 0x104   :  { %1798 = vmatpush3.bf16.msra.mxu0 %v2080_v41  ;;  %1801 = vmatprep.mubr.msk.bf16.mxu0 %vm279_vm2, %v1947_v45 }
 0x105   :  { %1799 = vmatprep.subr.bf16.mxu0 %v2078_v40 }
 0x108   :  { %1800 = vmatpush3.bf16.msra.mxu0 %v2078_v40 }
 0x109   :  { %1811 = vmatprep.subr.bf16.mxu0 %v2080_v41 }
 0x10b   :  { %1802 = vmatmul.mubr.msk.bf16.vlgmr.msra.gmra.mrb[12].mxu0 %vm279_vm2, %v1948_v46 }
 0x10c   :  { %1812 = vmatpush3.bf16.msra.mxu0 %v2080_v41  ;;  %1815 = vmatprep.mubr.msk.bf16.mxu0 %vm279_vm2, %v1949_v47 }
 0x10d   :  { %1813 = vmatprep.subr.bf16.mxu0 %v2078_v40 }
 0x110   :  { %1814 = vmatpush3.bf16.msra.mxu0 %v2078_v40 }
 0x111   :  { %1825 = vmatprep.subr.bf16.mxu0 %v2080_v41 }
 0x113   :  { %1816 = vmatmul.mubr.msk.bf16.vlgmr.msra.gmra.mrb[16].mxu0 %vm279_vm2, %v1950_v48 }
 0x114   :  { %1826 = vmatpush3.bf16.msra.mxu0 %v2080_v41  ;;  %1829 = vmatprep.mubr.msk.bf16.mxu0 %vm279_vm2, %v1951_v49 }
 0x115   :  { %1827 = vmatprep.subr.bf16.mxu0 %v2078_v40 }
 0x118   :  { %1828 = vmatpush3.bf16.msra.mxu0 %v2078_v40 }
 0x119   :  { %1839 = vmatprep.subr.bf16.mxu0 %v2080_v41 }
 0x11b   :  { %1830 = vmatmul.mubr.msk.bf16.vlgmr.msra.gmra.mrb[20].mxu0 %vm279_vm2, %v1952_v50  ;;  %v1975_v50 = vld [vmem:[%s2251_s3 + $0x38] sm:$0xff]  }
 0x11c   :  { %1840 = vmatpush3.bf16.msra.mxu0 %v2080_v41  ;;  %1843 = vmatprep.mubr.msk.bf16.mxu0 %vm279_vm2, %v1953_v51 }
 0x11d   :  { %1841 = vmatprep.subr.bf16.mxu0 %v2078_v40 }
 0x120   :  { %1842 = vmatpush3.bf16.msra.mxu0 %v2078_v40 }
 0x121   :  { %1853 = vmatprep.subr.bf16.mxu0 %v2080_v41 }
 0x123   :  { %1844 = vmatmul.mubr.msk.bf16.vlgmr.msra.gmra.mrb[24].mxu0 %vm279_vm2, %v1954_v52 }
 0x124   :  { %1854 = vmatpush3.bf16.msra.mxu0 %v2080_v41  ;;  %1857 = vmatprep.mubr.msk.bf16.mxu0 %vm279_vm2, %v1955_v53 }
 0x125   :  { %1855 = vmatprep.subr.bf16.mxu0 %v2078_v40 }
 0x128   :  { %1856 = vmatpush3.bf16.msra.mxu0 %v2078_v40 }
 0x129   :  { %1867 = vmatprep.subr.bf16.mxu0 %v2080_v41 }
 0x12b   :  { %1858 = vmatmul.mubr.msk.bf16.vlgmr.msra.gmra.mrb[28].mxu0 %vm279_vm2, %v1956_v54 }
 0x12c   :  { %1868 = vmatpush3.bf16.msra.mxu0 %v2080_v41  ;;  %1871 = vmatprep.mubr.msk.bf16.mxu0 %vm279_vm2, %v1957_v55 }
 0x12d   :  { %1869 = vmatprep.subr.bf16.mxu0 %v2078_v40 }
 0x130   :  { %1870 = vmatpush3.bf16.msra.mxu0 %v2078_v40 }
 0x131   :  { %1881 = vmatprep.subr.bf16.mxu0 %v2080_v41 }
 0x133   :  { %1872 = vmatmul.mubr.msk.bf16.vlgmr.msra.gmra.mrb[32].mxu0 %vm279_vm2, %v1958_v56  ;;  %v1976_v56 = vld [vmem:[%s2251_s3 + $0x40] sm:$0xff]  }
 0x134   :  { %1882 = vmatpush3.bf16.msra.mxu0 %v2080_v41  ;;  %1885 = vmatprep.mubr.msk.bf16.mxu0 %vm279_vm2, %v1959_v57  ;;  %v1543_v57 = vld [vmem:[%s2253_s4] ss:$0 sm:$0xff] }
 0x135   :  { %1883 = vmatprep.subr.bf16.mxu0 %v2078_v40 }
 0x138   :  { %1884 = vmatpush3.bf16.msra.mxu0 %v2078_v40 }
 0x13b   :  { %1886 = vmatmul.mubr.msk.bf16.vlgmr.msra.gmra.mrb[36].mxu0 %vm279_vm2, %v1960_v58 }
 0x1ce   :  { %v1775_v60 = vpop.f32.mrb[4].mxu0 }
 0x1cf   :  { %v320_v61 = vpop.f32.mrb[5].mxu0 }
 0x1d0   :  { %v1776_v62 = vpop.f32.mrb[6].mxu0 }
 0x1d1   :  { %v336_v63 = vpack.c.bf16 %v1776_v62, %v1775_v60  ;;  %v323_v0 = vpop.f32.mrb[7].mxu0 }
 0x1d2   :  { %v335_v1 = vpack.c.bf16 %v323_v0, %v320_v61 }
 0x1d4   :  { %1779 = vmatprep.mubr.msk.bf16.mxu1 %vm345_vm3, %v335_v1 }
 0x1d5   :  { %1780 = vmatmul.mubr.msk.bf16.vlgmr.msra.gmra.mrb[0].mxu1 %vm345_vm3, %v336_v63 }
 0x1d6   :  { %1792 = vmatpush3.bf16.msra.mxu1 %v1969_v59  ;;  %v1789_v3 = vpop.f32.mrb[8].mxu0 }
 0x1d7   :  { %v460_v4 = vpop.f32.mrb[9].mxu0  ;;  %1805 = vmatprep.subr.bf16.mxu1 %v1970_v2 }
 0x1d8   :  { %v1790_v5 = vpop.f32.mrb[10].mxu0 }
 0x1d9   :  { %v476_v6 = vpack.c.bf16 %v1790_v5, %v1789_v3  ;;  %v463_v7 = vpop.f32.mrb[11].mxu0 }
 0x1da   :  { %v475_v8 = vpack.c.bf16 %v463_v7, %v460_v4 }
 0x1dc   :  { %1793 = vmatprep.mubr.msk.bf16.mxu1 %vm345_vm3, %v475_v8 }
 0x1de   :  { %v1803_v9 = vpop.f32.mrb[12].mxu0 }
 0x1df   :  { %v600_v10 = vpop.f32.mrb[13].mxu0 }
 0x1e0   :  { %v1804_v12 = vpop.f32.mrb[14].mxu0 }
 0x1e1   :  { %1794 = vmatmul.mubr.msk.bf16.vlgmr.msra.gmra.mrb[0].mxu1 %vm345_vm3, %v476_v6  ;;  %v616_v13 = vpack.c.bf16 %v1804_v12, %v1803_v9  ;;  %v603_v14 = vpop.f32.mrb[15].mxu0 }
 0x1e2   :  { %1806 = vmatpush3.bf16.msra.mxu1 %v1970_v2  ;;  %v615_v15 = vpack.c.bf16 %v603_v14, %v600_v10 }
 0x1e3   :  { %1819 = vmatprep.subr.bf16.mxu1 %v1971_v11 }
 0x1e4   :  { %1807 = vmatprep.mubr.msk.bf16.mxu1 %vm345_vm3, %v615_v15 }
 0x1e6   :  { %v1817_v16 = vpop.f32.mrb[16].mxu0 }
 0x1e7   :  { %v740_v17 = vpop.f32.mrb[17].mxu0 }
 0x1e8   :  { %v1818_v18 = vpop.f32.mrb[18].mxu0 }
 0x1e9   :  { %v756_v19 = vpack.c.bf16 %v1818_v18, %v1817_v16  ;;  %v743_v20 = vpop.f32.mrb[19].mxu0 }
 0x1ea   :  { %v755_v21 = vpack.c.bf16 %v743_v20, %v740_v17 }
 0x1ed   :  { %1808 = vmatmul.mubr.msk.bf16.vlgmr.msra.gmra.mrb[0].mxu1 %vm345_vm3, %v616_v13 }
 0x1ee   :  { %1820 = vmatpush3.bf16.msra.mxu1 %v1971_v11  ;;  %1821 = vmatprep.mubr.msk.bf16.mxu1 %vm345_vm3, %v755_v21  ;;  %v1831_v23 = vpop.f32.mrb[20].mxu0 }
 0x1ef   :  { %1833 = vmatprep.subr.bf16.mxu1 %v1972_v22  ;;  %v880_v24 = vpop.f32.mrb[21].mxu0 }
 0x1f0   :  { %v1832_v25 = vpop.f32.mrb[22].mxu0 }
 0x1f1   :  { %v896_v26 = vpack.c.bf16 %v1832_v25, %v1831_v23  ;;  %v883_v27 = vpop.f32.mrb[23].mxu0 }
 0x1f2   :  { %v895_v28 = vpack.c.bf16 %v883_v27, %v880_v24 }
 0x1f6   :  { %v1845_v29 = vpop.f32.mrb[24].mxu0 }
 0x1f7   :  { %v1020_v31 = vpop.f32.mrb[25].mxu0 }
 0x1f8   :  { %v1846_v32 = vpop.f32.mrb[26].mxu0 }
 0x1f9   :  { %1822 = vmatmul.mubr.msk.bf16.vlgmr.msra.gmra.mrb[0].mxu1 %vm345_vm3, %v756_v19  ;;  %v1036_v33 = vpack.c.bf16 %v1846_v32, %v1845_v29  ;;  %v1023_v34 = vpop.f32.mrb[27].mxu0 }
 0x1fa   :  { %1834 = vmatpush3.bf16.msra.mxu1 %v1972_v22  ;;  %1835 = vmatprep.mubr.msk.bf16.mxu1 %vm345_vm3, %v895_v28  ;;  %v1035_v35 = vpack.c.bf16 %v1023_v34, %v1020_v31 }
 0x1fb   :  { %1847 = vmatprep.subr.bf16.mxu1 %v1973_v30 }
 0x1fe   :  { %v1859_v36 = vpop.f32.mrb[28].mxu0 }
 0x1ff   :  { %v1160_v37 = vpop.f32.mrb[29].mxu0 }
 0x200   :  { %v1860_v38 = vpop.f32.mrb[30].mxu0 }
 0x201   :  { %v1176_v39 = vpack.c.bf16 %v1860_v38, %v1859_v36  ;;  %v1163_v40 = vpop.f32.mrb[31].mxu0 }
 0x202   :  { %v1175_v41 = vpack.c.bf16 %v1163_v40, %v1160_v37 }
 0x205   :  { %1836 = vmatmul.mubr.msk.bf16.vlgmr.msra.gmra.mrb[0].mxu1 %vm345_vm3, %v896_v26 }
 0x206   :  { %1848 = vmatpush3.bf16.msra.mxu1 %v1973_v30  ;;  %1849 = vmatprep.mubr.msk.bf16.mxu1 %vm345_vm3, %v1035_v35  ;;  %v1873_v43 = vpop.f32.mrb[32].mxu0 }
 0x207   :  { %1861 = vmatprep.subr.bf16.mxu1 %v1974_v42  ;;  %v1300_v44 = vpop.f32.mrb[33].mxu0 }
 0x208   :  { %v1874_v45 = vpop.f32.mrb[34].mxu0 }
 0x209   :  { %v1316_v46 = vpack.c.bf16 %v1874_v45, %v1873_v43  ;;  %v1303_v47 = vpop.f32.mrb[35].mxu0 }
 0x20a   :  { %v1315_v48 = vpack.c.bf16 %v1303_v47, %v1300_v44 }
 0x20e   :  { %v1887_v49 = vpop.f32.mrb[36].mxu0 }
 0x20f   :  { %v1440_v51 = vpop.f32.mrb[37].mxu0 }
 0x210   :  { %v1888_v52 = vpop.f32.mrb[38].mxu0 }
 0x211   :  { %1850 = vmatmul.mubr.msk.bf16.vlgmr.msra.gmra.mrb[0].mxu1 %vm345_vm3, %v1036_v33  ;;  %v1456_v53 = vpack.c.bf16 %v1888_v52, %v1887_v49  ;;  %v1443_v54 = vpop.f32.mrb[39].mxu0 }
 0x212   :  { %1862 = vmatpush3.bf16.msra.mxu1 %v1974_v42  ;;  %1863 = vmatprep.mubr.msk.bf16.mxu1 %vm345_vm3, %v1175_v41  ;;  %v1455_v55 = vpack.c.bf16 %v1443_v54, %v1440_v51 }
 0x213   :  { %1875 = vmatprep.subr.bf16.mxu1 %v1975_v50 }
 0x21d   :  { %1864 = vmatmul.mubr.msk.bf16.vlgmr.msra.gmra.mrb[0].mxu1 %vm345_vm3, %v1176_v39 }
 0x21e   :  { %1876 = vmatpush3.bf16.msra.mxu1 %v1975_v50  ;;  %1877 = vmatprep.mubr.msk.bf16.mxu1 %vm345_vm3, %v1315_v48 }
 0x21f   :  { %1889 = vmatprep.subr.bf16.mxu1 %v1976_v56 }
 0x229   :  { %1878 = vmatmul.mubr.msk.bf16.vlgmr.msra.gmra.mrb[0].mxu1 %vm345_vm3, %v1316_v46 }
 0x22a   :  { %1890 = vmatpush3.bf16.msra.mxu1 %v1976_v56  ;;  %1891 = vmatprep.mubr.msk.bf16.mxu1 %vm345_vm3, %v1455_v55 }
 0x235   :  { %1892 = vmatmul.mubr.msk.bf16.vlgmr.msra.gmra.mrb[0].mxu1 %vm345_vm3, %v1456_v53 }
 0x308   :  { %v1893_v58 = vpop.f32.mrb[0].mxu1 }
 0x309   :  { %v1895_v59 = vadd.f32 %v1893_v58, %v1543_v57  ;;  %v1506_v60 = vpop.f32.mrb[1].mxu1 }
 0x30a   :  { %v1896_v61 = vadd.f32 %v1543_v57, %v1506_v60  ;;  %v1894_v62 = vpop.f32.mrb[2].mxu1 }
 0x30b   :  { %1527 = vst.msk [vmem:[%s2254_s7 + $0x10] sm:$0xff] %vm345_vm3, %v1895_v59  ;;  %v1897_v63 = vadd.f32 %v1894_v62, %v1543_v57  ;;  %v1509_v0 = vpop.f32.mrb[3].mxu1 }
 0x30c   :  { %1525 = vst.msk [vmem:[%s2254_s7] sm:$0xff] %vm345_vm3, %v1896_v61  ;;  %v1898_v1 = vadd.f32 %v1543_v57, %v1509_v0 }
 0x30d   :  { %1528 = vst.msk [vmem:[%s2254_s7 + $0x18] sm:$0xff] %vm345_vm3, %v1897_v63 }
 0x30e   :  { %1526 = vst.msk [vmem:[%s2254_s7 + $0x8] sm:$0xff] %vm345_vm3, %v1898_v1 }

</bundles_post_ra>
